<compile_context>
chip_gen: v5e
topology: v5e:2x2
jax: 0.10.0
libtpu: 0.0.40
codegen_flags: <defaults>
</compile_context>

<pallas_src>
import jax
import jax.numpy as jnp
from jax import lax
from jax.experimental import pallas as pl
from jax.experimental.pallas import tpu as pltpu


def _slot_crf_kernel(emis_ref, tags_ref, mask_ref, start_ref, end_ref,
                     trans2d_ref, trans3d_ref, llh_ref, ntok_ref):
    """Per-B-tile CRF numerator + forward algorithm, batch on the lane axis.

    Ref shapes (Bt = batch tile on lanes):
      emis_ref   : (T, K, Bt) f32   emissions[t, tag, b]
      tags_ref   : (T, Bt)    i32   gold tags
      mask_ref   : (T, Bt)    f32   {0,1}; contiguous prefix, mask[0, :] == 1
      start_ref  : (K, 1)     f32   start_transitions
      end_ref    : (K, 1)     f32   end_transitions
      trans2d_ref: (K, K)     f32   transitions[from, to]      (MXU operand)
      trans3d_ref: (K, K, 1)  f32   same values, pre-expanded  (broadcast operand)
      llh_ref    : (1, Bt)    f32   per-sequence log-likelihood (num - denom)
      ntok_ref   : (1, Bt)    f32   per-sequence token count
    """
    T, K, Bt = emis_ref.shape

    start = start_ref[...]                       # (K, 1) -> lane-broadcasts
    end = end_ref[...]                           # (K, 1)
    trans2d = trans2d_ref[...]                   # (K, K)
    trans3d = trans3d_ref[...]                   # (K, K, 1), loop-invariant

    k_iota = lax.broadcasted_iota(jnp.int32, (K, Bt), 0)

    # ------------------------------ t = 0 -------------------------------
    emis0 = emis_ref[0]                                            # (K, Bt)
    oh0 = (k_iota == tags_ref[0:1, :]).astype(jnp.float32)         # (K, Bt)
    num0 = jnp.sum(oh0 * (start + emis0), axis=0, keepdims=True)   # (1, Bt)
    end0 = jnp.sum(oh0 * end, axis=0, keepdims=True)               # (1, Bt)
    score0 = start + emis0                                         # (K, Bt)

    def step(t, carry):
        score, prev_oh, num, end_sc = carry
        emis_t = emis_ref[t]                                       # (K, Bt)
        tags_t = tags_ref[pl.ds(t, 1), :]                          # (1, Bt)
        mask_t = mask_ref[pl.ds(t, 1), :]                          # (1, Bt)
        oh_t = (k_iota == tags_t).astype(jnp.float32)              # (K, Bt)
        keep = mask_t > 0.5                                        # (1, Bt)

        # ---------------- gold-path numerator pieces ----------------
        emis_at = jnp.sum(oh_t * emis_t, axis=0, keepdims=True)    # (1, Bt)
        if K >= 16:
            # transitions row selected by the current tag's one-hot -> MXU.
            tr_rows = jnp.dot(trans2d, oh_t,
                              preferred_element_type=jnp.float32)  # (K, Bt)
        else:
            # K too small to be worth an MXU push; tiny VPU/XLU contraction.
            tr_rows = jnp.sum(trans3d * oh_t[None, :, :], axis=1)  # (K, Bt)
        trans_at = jnp.sum(prev_oh * tr_rows, axis=0, keepdims=True)   # (1, Bt)
        num = num + mask_t * (trans_at + emis_at)

        # Running "end score at last valid position" (mask is a prefix).
        end_at = jnp.sum(oh_t * end, axis=0, keepdims=True)        # (1, Bt)
        end_sc = jnp.where(keep, end_at, end_sc)

        # ---------------- forward recursion (log Z) -----------------
        # tmp[i, j, b] = score[i, b] + trans[i, j]; reduce over predecessors i.
        tmp = score[:, None, :] + trans3d                          # (K, K, Bt)
        m = jnp.max(tmp, axis=0)                                   # (K, Bt)
        nxt = m + jnp.log(jnp.sum(jnp.exp(tmp - m[None, :, :]), axis=0)) + emis_t
        score = jnp.where(keep, nxt, score)
        return score, oh_t, num, end_sc

    score, _, num, end_sc = lax.fori_loop(
        1, T, step, (score0, oh0, num0, end0), unroll=(T <= 32))

    # ----------------------------- finalize ------------------------------
    score_end = score + end                                        # (K, Bt)
    m = jnp.max(score_end, axis=0, keepdims=True)                  # (1, Bt)
    denom = m + jnp.log(jnp.sum(jnp.exp(score_end - m), axis=0, keepdims=True))

    llh_ref[...] = num + end_sc - denom
    ntok_ref[...] = jnp.sum(mask_ref[...], axis=0, keepdims=True)


def slot_crf_token_mean(emissions, tags, mask,
                        start_transitions, end_transitions, transitions):
    """emissions (B,T,K), tags (B,T) int, mask (B,T) {0,1} -> scalar token_mean llh.

    Assumes mask is a contiguous prefix with mask[:, 0] == 1 (torchcrf requirement).
    """
    B, T, K = emissions.shape

    # Lane density: put the batch on the 128-wide lane axis.
    emis_tkb = jnp.transpose(emissions.astype(jnp.float32), (1, 2, 0))   # (T, K, B)
    tags_tb = jnp.transpose(tags.astype(jnp.int32), (1, 0))              # (T, B)
    mask_tb = jnp.transpose(mask.astype(jnp.float32), (1, 0))            # (T, B)
    start2d = start_transitions.astype(jnp.float32).reshape(K, 1)
    end2d = end_transitions.astype(jnp.float32).reshape(K, 1)
    trans2d = transitions.astype(jnp.float32)
    trans3d = trans2d.reshape(K, K, 1)

    # Batch tile: lane-dense (128) whenever it divides B, otherwise whole batch.
    bt = 128 if (B % 128 == 0) else B
    nb = B // bt

    cost = pl.CostEstimate(
        flops=int(B * T * (7 * K * K + 12 * K)),
        transcendentals=int(B * T * K * (K + 1)),      # exp K^2 + log K per step
        bytes_accessed=int(4 * (B * T * K + 2 * B * T + 2 * K + 2 * K * K + 2 * B)),
    )

    llh, ntok = pl.pallas_call(
        _slot_crf_kernel,
        out_shape=(jax.ShapeDtypeStruct((1, B), jnp.float32),
                   jax.ShapeDtypeStruct((1, B), jnp.float32)),
        grid=(nb,),
        in_specs=[
            pl.BlockSpec((T, K, bt), lambda i: (0, 0, i)),   # emissions (T,K,B)
            pl.BlockSpec((T, bt), lambda i: (0, i)),         # tags (T,B)
            pl.BlockSpec((T, bt), lambda i: (0, i)),         # mask (T,B)
            pl.BlockSpec((K, 1), lambda i: (0, 0)),          # start_transitions
            pl.BlockSpec((K, 1), lambda i: (0, 0)),          # end_transitions
            pl.BlockSpec((K, K), lambda i: (0, 0)),          # transitions (2-D)
            pl.BlockSpec((K, K, 1), lambda i: (0, 0, 0)),    # transitions (bcast)
        ],
        out_specs=(pl.BlockSpec((1, bt), lambda i: (0, i)),
                   pl.BlockSpec((1, bt), lambda i: (0, i))),
        compiler_params=pltpu.CompilerParams(
            # Batch tiles are independent -> megacore / dual-TC sharding on v7x.
            dimension_semantics=("parallel",),
        ),
        cost_estimate=cost,
    )(emis_tkb, tags_tb, mask_tb, start2d, end2d, trans2d, trans3d)

    # token_mean: final cross-tile reduction + division in plain JAX.
    return jnp.sum(llh) / jnp.sum(ntok)


def _crf_token_mean_ref(emissions, tags, mask, start, end, trans):
    """Pure-JAX reference mirroring torchcrf CRF.forward(..., 'token_mean')."""
    B, T, K = emissions.shape
    maskf = mask.astype(jnp.float32)
    tags_oh = jax.nn.one_hot(tags, K, dtype=jnp.float32)
    emis_at = jnp.sum(emissions * tags_oh, axis=-1)                  # (B, T)
    trans_at = trans[tags[:, :-1], tags[:, 1:]]                      # (B, T-1)
    start_sc = start[tags[:, 0]]
    seq_len = jnp.sum(mask.astype(jnp.int32), axis=-1)
    last_tags = tags[jnp.arange(B), seq_len - 1]
    end_sc = end[last_tags]
    numerator = (start_sc + emis_at[:, 0]
                 + jnp.sum(maskf[:, 1:] * (trans_at + emis_at[:, 1:]), axis=-1)
                 + end_sc)

    score = start[None, :] + emissions[:, 0]
    for t in range(1, T):
        ns = score[:, :, None] + trans[None] + emissions[:, t][:, None, :]
        ns = jax.scipy.special.logsumexp(ns, axis=1)
        score = jnp.where(maskf[:, t][:, None] > 0.5, ns, score)
    score = score + end[None, :]
    denom = jax.scipy.special.logsumexp(score, axis=1)
    return jnp.sum(numerator - denom) / jnp.sum(maskf)


if __name__ == "__main__":
    B, T, K = 2, 8, 8   # batch, sequence length, num_tags

    key = jax.random.PRNGKey(0)
    k_e, k_t, k_s, k_en, k_tr = jax.random.split(key, 5)

    slots = jax.random.normal(k_e, (B, T, K), jnp.float32)           # emissions
    tags = jax.random.randint(k_t, (B, T), 0, K, jnp.int32)
    lengths = jnp.array([T, 5], jnp.int32)                            # mask[:, 0] == 1
    mask = (jnp.arange(T)[None, :] < lengths[:, None]).astype(jnp.float32)

    # CRF parameters (torchcrf default init: U(-0.1, 0.1)).
    start = jax.random.uniform(k_s, (K,), jnp.float32, -0.1, 0.1)
    end = jax.random.uniform(k_en, (K,), jnp.float32, -0.1, 0.1)
    trans = jax.random.uniform(k_tr, (K, K), jnp.float32, -0.1, 0.1)

    out = jax.block_until_ready(
        slot_crf_token_mean(slots, tags, mask, start, end, trans))

    ref = _crf_token_mean_ref(slots, tags, mask, start, end, trans)
    assert out.shape == ()
    assert jnp.allclose(out, ref, atol=1e-4, rtol=1e-4), (out, ref)

    print("KERNEL_OK")
</pallas_src>

<mosaic_0001>
module attributes {stable_mosaic.version = 11 : i64} {
  func.func @_slot_crf_kernel(%arg0: i32, %arg1: memref<8x8x2xf32, #tpu.memory_space<vmem>>, %arg2: memref<8x2xi32, #tpu.memory_space<vmem>>, %arg3: memref<8x2xf32, #tpu.memory_space<vmem>>, %arg4: memref<8x1xf32, #tpu.memory_space<vmem>>, %arg5: memref<8x1xf32, #tpu.memory_space<vmem>>, %arg6: memref<8x8xf32, #tpu.memory_space<vmem>>, %arg7: memref<8x8x1xf32, #tpu.memory_space<vmem>>, %arg8: memref<1x2xf32, #tpu.memory_space<vmem>>, %arg9: memref<1x2xf32, #tpu.memory_space<vmem>>) attributes {dimension_semantics = [#tpu.dimension_semantics<parallel>], iteration_bounds = array<i64: 1>, scalar_prefetch = 0 : i64, scratch_operands = 0 : i64, tpu.core_type = #tpu.core_type<tc>, window_params = [{transform_indices = @transform_0, window_bounds = array<i64: 8, 8, 2>}, {transform_indices = @transform_1, window_bounds = array<i64: 8, 2>}, {transform_indices = @transform_2, window_bounds = array<i64: 8, 2>}, {pipeline_mode = #tpu.pipeline_mode<synchronous>, transform_indices = @transform_3, window_bounds = array<i64: 8, 1>}, {pipeline_mode = #tpu.pipeline_mode<synchronous>, transform_indices = @transform_4, window_bounds = array<i64: 8, 1>}, {pipeline_mode = #tpu.pipeline_mode<synchronous>, transform_indices = @transform_5, window_bounds = array<i64: 8, 8>}, {pipeline_mode = #tpu.pipeline_mode<synchronous>, transform_indices = @transform_6, window_bounds = array<i64: 8, 8, 1>}, {transform_indices = @transform_7, window_bounds = array<i64: 1, 2>}, {transform_indices = @transform_8, window_bounds = array<i64: 1, 2>}]} {
    %c0 = arith.constant 0 : index
    %c0_0 = arith.constant 0 : index
    %0 = vector.load %arg4[%c0, %c0_0] : memref<8x1xf32, #tpu.memory_space<vmem>>, vector<8x1xf32>
    %c0_1 = arith.constant 0 : index
    %c0_2 = arith.constant 0 : index
    %1 = vector.load %arg5[%c0_1, %c0_2] : memref<8x1xf32, #tpu.memory_space<vmem>>, vector<8x1xf32>
    %c0_3 = arith.constant 0 : index
    %c0_4 = arith.constant 0 : index
    %c0_5 = arith.constant 0 : index
    %2 = vector.load %arg7[%c0_3, %c0_4, %c0_5] : memref<8x8x1xf32, #tpu.memory_space<vmem>>, vector<8x8x1xf32>
    %3 = tpu.iota {dimensions = array<i32: 0>} : vector<8x2xi32>
    %c0_6 = arith.constant 0 : index
    %c0_7 = arith.constant 0 : index
    %c0_8 = arith.constant 0 : index
    %4 = vector.load %arg1[%c0_6, %c0_7, %c0_8] : memref<8x8x2xf32, #tpu.memory_space<vmem>>, vector<1x8x2xf32>
    %5 = vector.shape_cast %4 : vector<1x8x2xf32> to vector<8x2xf32>
    %c0_9 = arith.constant 0 : index
    %c0_10 = arith.constant 0 : index
    %6 = vector.load %arg2[%c0_9, %c0_10] : memref<8x2xi32, #tpu.memory_space<vmem>>, vector<1x2xi32>
    %7 = vector.broadcast %6 : vector<1x2xi32> to vector<8x2xi32>
    %8 = arith.cmpi eq, %3, %7 : vector<8x2xi32>
    %9 = arith.extui %8 : vector<8x2xi1> to vector<8x2xi32>
    %10 = arith.sitofp %9 : vector<8x2xi32> to vector<8x2xf32>
    %11 = vector.broadcast %0 : vector<8x1xf32> to vector<8x2xf32>
    %12 = arith.addf %11, %5 : vector<8x2xf32>
    %13 = arith.mulf %10, %12 : vector<8x2xf32>
    %cst = arith.constant dense<0.000000e+00> : vector<2xf32>
    %14 = vector.multi_reduction <add>, %13, %cst [0] : vector<8x2xf32> to vector<2xf32>
    %15 = vector.shape_cast %14 : vector<2xf32> to vector<1x2xf32>
    %16 = vector.broadcast %1 : vector<8x1xf32> to vector<8x2xf32>
    %17 = arith.mulf %10, %16 : vector<8x2xf32>
    %cst_11 = arith.constant dense<0.000000e+00> : vector<2xf32>
    %18 = vector.multi_reduction <add>, %17, %cst_11 [0] : vector<8x2xf32> to vector<2xf32>
    %19 = vector.shape_cast %18 : vector<2xf32> to vector<1x2xf32>
    %20 = vector.broadcast %0 : vector<8x1xf32> to vector<8x2xf32>
    %21 = arith.addf %20, %5 : vector<8x2xf32>
    %c1_i32 = arith.constant 1 : i32
    %22 = arith.index_cast %c1_i32 : i32 to index
    %c0_12 = arith.constant 0 : index
    %c0_13 = arith.constant 0 : index
    %23 = vector.load %arg1[%22, %c0_12, %c0_13] : memref<8x8x2xf32, #tpu.memory_space<vmem>>, vector<1x8x2xf32>
    %24 = vector.shape_cast %23 : vector<1x8x2xf32> to vector<8x2xf32>
    %25 = arith.index_cast %c1_i32 : i32 to index
    %c0_14 = arith.constant 0 : index
    %26 = vector.load %arg2[%25, %c0_14] : memref<8x2xi32, #tpu.memory_space<vmem>>, vector<1x2xi32>
    %27 = arith.index_cast %c1_i32 : i32 to index
    %c0_15 = arith.constant 0 : index
    %28 = vector.load %arg3[%27, %c0_15] : memref<8x2xf32, #tpu.memory_space<vmem>>, vector<1x2xf32>
    %29 = vector.broadcast %26 : vector<1x2xi32> to vector<8x2xi32>
    %30 = arith.cmpi eq, %3, %29 : vector<8x2xi32>
    %31 = arith.extui %30 : vector<8x2xi1> to vector<8x2xi32>
    %32 = arith.sitofp %31 : vector<8x2xi32> to vector<8x2xf32>
    %cst_16 = arith.constant 5.000000e-01 : f32
    %33 = vector.broadcast %cst_16 : f32 to vector<1x2xf32>
    %34 = arith.cmpf ogt, %28, %33 : vector<1x2xf32>
    %35 = arith.mulf %32, %24 : vector<8x2xf32>
    %cst_17 = arith.constant dense<0.000000e+00> : vector<2xf32>
    %36 = vector.multi_reduction <add>, %35, %cst_17 [0] : vector<8x2xf32> to vector<2xf32>
    %37 = vector.shape_cast %36 : vector<2xf32> to vector<1x2xf32>
    %38 = vector.shape_cast %32 : vector<8x2xf32> to vector<1x8x2xf32>
    %39 = vector.broadcast %2 : vector<8x8x1xf32> to vector<8x8x2xf32>
    %40 = vector.broadcast %38 : vector<1x8x2xf32> to vector<8x8x2xf32>
    %41 = arith.mulf %39, %40 : vector<8x8x2xf32>
    %cst_18 = arith.constant dense<0.000000e+00> : vector<8x2xf32>
    %42 = vector.multi_reduction <add>, %41, %cst_18 [1] : vector<8x8x2xf32> to vector<8x2xf32>
    %43 = arith.mulf %10, %42 : vector<8x2xf32>
    %cst_19 = arith.constant dense<0.000000e+00> : vector<2xf32>
    %44 = vector.multi_reduction <add>, %43, %cst_19 [0] : vector<8x2xf32> to vector<2xf32>
    %45 = vector.shape_cast %44 : vector<2xf32> to vector<1x2xf32>
    %46 = arith.addf %45, %37 : vector<1x2xf32>
    %47 = arith.mulf %28, %46 : vector<1x2xf32>
    %48 = arith.addf %15, %47 : vector<1x2xf32>
    %49 = vector.broadcast %1 : vector<8x1xf32> to vector<8x2xf32>
    %50 = arith.mulf %32, %49 : vector<8x2xf32>
    %cst_20 = arith.constant dense<0.000000e+00> : vector<2xf32>
    %51 = vector.multi_reduction <add>, %50, %cst_20 [0] : vector<8x2xf32> to vector<2xf32>
    %52 = vector.shape_cast %51 : vector<2xf32> to vector<1x2xf32>
    %53 = arith.select %34, %52, %19 : vector<1x2xi1>, vector<1x2xf32>
    %54 = vector.shape_cast %21 : vector<8x2xf32> to vector<8x1x2xf32>
    %55 = vector.broadcast %54 : vector<8x1x2xf32> to vector<8x8x2xf32>
    %56 = vector.broadcast %2 : vector<8x8x1xf32> to vector<8x8x2xf32>
    %57 = arith.addf %55, %56 : vector<8x8x2xf32>
    %cst_21 = arith.constant dense<0xFF800000> : vector<8x2xf32>
    %58 = vector.multi_reduction <maximumf>, %57, %cst_21 [0] : vector<8x8x2xf32> to vector<8x2xf32>
    %59 = vector.shape_cast %58 : vector<8x2xf32> to vector<1x8x2xf32>
    %60 = vector.broadcast %59 : vector<1x8x2xf32> to vector<8x8x2xf32>
    %61 = arith.subf %57, %60 : vector<8x8x2xf32>
    %62 = math.exp %61 : vector<8x8x2xf32>
    %cst_22 = arith.constant dense<0.000000e+00> : vector<8x2xf32>
    %63 = vector.multi_reduction <add>, %62, %cst_22 [0] : vector<8x8x2xf32> to vector<8x2xf32>
    %64 = math.log %63 : vector<8x2xf32>
    %65 = arith.addf %58, %64 : vector<8x2xf32>
    %66 = arith.addf %65, %24 : vector<8x2xf32>
    %67 = vector.shape_cast %34 : vector<1x2xi1> to vector<1x2xi1>
    %68 = vector.broadcast %67 : vector<1x2xi1> to vector<8x2xi1>
    %69 = arith.select %68, %66, %21 : vector<8x2xi1>, vector<8x2xf32>
    %c2_i32 = arith.constant 2 : i32
    %70 = arith.index_cast %c2_i32 : i32 to index
    %c0_23 = arith.constant 0 : index
    %c0_24 = arith.constant 0 : index
    %71 = vector.load %arg1[%70, %c0_23, %c0_24] : memref<8x8x2xf32, #tpu.memory_space<vmem>>, vector<1x8x2xf32>
    %72 = vector.shape_cast %71 : vector<1x8x2xf32> to vector<8x2xf32>
    %73 = arith.index_cast %c2_i32 : i32 to index
    %c0_25 = arith.constant 0 : index
    %74 = vector.load %arg2[%73, %c0_25] : memref<8x2xi32, #tpu.memory_space<vmem>>, vector<1x2xi32>
    %75 = arith.index_cast %c2_i32 : i32 to index
    %c0_26 = arith.constant 0 : index
    %76 = vector.load %arg3[%75, %c0_26] : memref<8x2xf32, #tpu.memory_space<vmem>>, vector<1x2xf32>
    %77 = vector.broadcast %74 : vector<1x2xi32> to vector<8x2xi32>
    %78 = arith.cmpi eq, %3, %77 : vector<8x2xi32>
    %79 = arith.extui %78 : vector<8x2xi1> to vector<8x2xi32>
    %80 = arith.sitofp %79 : vector<8x2xi32> to vector<8x2xf32>
    %cst_27 = arith.constant 5.000000e-01 : f32
    %81 = vector.broadcast %cst_27 : f32 to vector<1x2xf32>
    %82 = arith.cmpf ogt, %76, %81 : vector<1x2xf32>
    %83 = arith.mulf %80, %72 : vector<8x2xf32>
    %cst_28 = arith.constant dense<0.000000e+00> : vector<2xf32>
    %84 = vector.multi_reduction <add>, %83, %cst_28 [0] : vector<8x2xf32> to vector<2xf32>
    %85 = vector.shape_cast %84 : vector<2xf32> to vector<1x2xf32>
    %86 = vector.shape_cast %80 : vector<8x2xf32> to vector<1x8x2xf32>
    %87 = vector.broadcast %2 : vector<8x8x1xf32> to vector<8x8x2xf32>
    %88 = vector.broadcast %86 : vector<1x8x2xf32> to vector<8x8x2xf32>
    %89 = arith.mulf %87, %88 : vector<8x8x2xf32>
    %cst_29 = arith.constant dense<0.000000e+00> : vector<8x2xf32>
    %90 = vector.multi_reduction <add>, %89, %cst_29 [1] : vector<8x8x2xf32> to vector<8x2xf32>
    %91 = arith.mulf %32, %90 : vector<8x2xf32>
    %cst_30 = arith.constant dense<0.000000e+00> : vector<2xf32>
    %92 = vector.multi_reduction <add>, %91, %cst_30 [0] : vector<8x2xf32> to vector<2xf32>
    %93 = vector.shape_cast %92 : vector<2xf32> to vector<1x2xf32>
    %94 = arith.addf %93, %85 : vector<1x2xf32>
    %95 = arith.mulf %76, %94 : vector<1x2xf32>
    %96 = arith.addf %48, %95 : vector<1x2xf32>
    %97 = vector.broadcast %1 : vector<8x1xf32> to vector<8x2xf32>
    %98 = arith.mulf %80, %97 : vector<8x2xf32>
    %cst_31 = arith.constant dense<0.000000e+00> : vector<2xf32>
    %99 = vector.multi_reduction <add>, %98, %cst_31 [0] : vector<8x2xf32> to vector<2xf32>
    %100 = vector.shape_cast %99 : vector<2xf32> to vector<1x2xf32>
    %101 = arith.select %82, %100, %53 : vector<1x2xi1>, vector<1x2xf32>
    %102 = vector.shape_cast %69 : vector<8x2xf32> to vector<8x1x2xf32>
    %103 = vector.broadcast %102 : vector<8x1x2xf32> to vector<8x8x2xf32>
    %104 = vector.broadcast %2 : vector<8x8x1xf32> to vector<8x8x2xf32>
    %105 = arith.addf %103, %104 : vector<8x8x2xf32>
    %cst_32 = arith.constant dense<0xFF800000> : vector<8x2xf32>
    %106 = vector.multi_reduction <maximumf>, %105, %cst_32 [0] : vector<8x8x2xf32> to vector<8x2xf32>
    %107 = vector.shape_cast %106 : vector<8x2xf32> to vector<1x8x2xf32>
    %108 = vector.broadcast %107 : vector<1x8x2xf32> to vector<8x8x2xf32>
    %109 = arith.subf %105, %108 : vector<8x8x2xf32>
    %110 = math.exp %109 : vector<8x8x2xf32>
    %cst_33 = arith.constant dense<0.000000e+00> : vector<8x2xf32>
    %111 = vector.multi_reduction <add>, %110, %cst_33 [0] : vector<8x8x2xf32> to vector<8x2xf32>
    %112 = math.log %111 : vector<8x2xf32>
    %113 = arith.addf %106, %112 : vector<8x2xf32>
    %114 = arith.addf %113, %72 : vector<8x2xf32>
    %115 = vector.shape_cast %82 : vector<1x2xi1> to vector<1x2xi1>
    %116 = vector.broadcast %115 : vector<1x2xi1> to vector<8x2xi1>
    %117 = arith.select %116, %114, %69 : vector<8x2xi1>, vector<8x2xf32>
    %c3_i32 = arith.constant 3 : i32
    %118 = arith.index_cast %c3_i32 : i32 to index
    %c0_34 = arith.constant 0 : index
    %c0_35 = arith.constant 0 : index
    %119 = vector.load %arg1[%118, %c0_34, %c0_35] : memref<8x8x2xf32, #tpu.memory_space<vmem>>, vector<1x8x2xf32>
    %120 = vector.shape_cast %119 : vector<1x8x2xf32> to vector<8x2xf32>
    %121 = arith.index_cast %c3_i32 : i32 to index
    %c0_36 = arith.constant 0 : index
    %122 = vector.load %arg2[%121, %c0_36] : memref<8x2xi32, #tpu.memory_space<vmem>>, vector<1x2xi32>
    %123 = arith.index_cast %c3_i32 : i32 to index
    %c0_37 = arith.constant 0 : index
    %124 = vector.load %arg3[%123, %c0_37] : memref<8x2xf32, #tpu.memory_space<vmem>>, vector<1x2xf32>
    %125 = vector.broadcast %122 : vector<1x2xi32> to vector<8x2xi32>
    %126 = arith.cmpi eq, %3, %125 : vector<8x2xi32>
    %127 = arith.extui %126 : vector<8x2xi1> to vector<8x2xi32>
    %128 = arith.sitofp %127 : vector<8x2xi32> to vector<8x2xf32>
    %cst_38 = arith.constant 5.000000e-01 : f32
    %129 = vector.broadcast %cst_38 : f32 to vector<1x2xf32>
    %130 = arith.cmpf ogt, %124, %129 : vector<1x2xf32>
    %131 = arith.mulf %128, %120 : vector<8x2xf32>
    %cst_39 = arith.constant dense<0.000000e+00> : vector<2xf32>
    %132 = vector.multi_reduction <add>, %131, %cst_39 [0] : vector<8x2xf32> to vector<2xf32>
    %133 = vector.shape_cast %132 : vector<2xf32> to vector<1x2xf32>
    %134 = vector.shape_cast %128 : vector<8x2xf32> to vector<1x8x2xf32>
    %135 = vector.broadcast %2 : vector<8x8x1xf32> to vector<8x8x2xf32>
    %136 = vector.broadcast %134 : vector<1x8x2xf32> to vector<8x8x2xf32>
    %137 = arith.mulf %135, %136 : vector<8x8x2xf32>
    %cst_40 = arith.constant dense<0.000000e+00> : vector<8x2xf32>
    %138 = vector.multi_reduction <add>, %137, %cst_40 [1] : vector<8x8x2xf32> to vector<8x2xf32>
    %139 = arith.mulf %80, %138 : vector<8x2xf32>
    %cst_41 = arith.constant dense<0.000000e+00> : vector<2xf32>
    %140 = vector.multi_reduction <add>, %139, %cst_41 [0] : vector<8x2xf32> to vector<2xf32>
    %141 = vector.shape_cast %140 : vector<2xf32> to vector<1x2xf32>
    %142 = arith.addf %141, %133 : vector<1x2xf32>
    %143 = arith.mulf %124, %142 : vector<1x2xf32>
    %144 = arith.addf %96, %143 : vector<1x2xf32>
    %145 = vector.broadcast %1 : vector<8x1xf32> to vector<8x2xf32>
    %146 = arith.mulf %128, %145 : vector<8x2xf32>
    %cst_42 = arith.constant dense<0.000000e+00> : vector<2xf32>
    %147 = vector.multi_reduction <add>, %146, %cst_42 [0] : vector<8x2xf32> to vector<2xf32>
    %148 = vector.shape_cast %147 : vector<2xf32> to vector<1x2xf32>
    %149 = arith.select %130, %148, %101 : vector<1x2xi1>, vector<1x2xf32>
    %150 = vector.shape_cast %117 : vector<8x2xf32> to vector<8x1x2xf32>
    %151 = vector.broadcast %150 : vector<8x1x2xf32> to vector<8x8x2xf32>
    %152 = vector.broadcast %2 : vector<8x8x1xf32> to vector<8x8x2xf32>
    %153 = arith.addf %151, %152 : vector<8x8x2xf32>
    %cst_43 = arith.constant dense<0xFF800000> : vector<8x2xf32>
    %154 = vector.multi_reduction <maximumf>, %153, %cst_43 [0] : vector<8x8x2xf32> to vector<8x2xf32>
    %155 = vector.shape_cast %154 : vector<8x2xf32> to vector<1x8x2xf32>
    %156 = vector.broadcast %155 : vector<1x8x2xf32> to vector<8x8x2xf32>
    %157 = arith.subf %153, %156 : vector<8x8x2xf32>
    %158 = math.exp %157 : vector<8x8x2xf32>
    %cst_44 = arith.constant dense<0.000000e+00> : vector<8x2xf32>
    %159 = vector.multi_reduction <add>, %158, %cst_44 [0] : vector<8x8x2xf32> to vector<8x2xf32>
    %160 = math.log %159 : vector<8x2xf32>
    %161 = arith.addf %154, %160 : vector<8x2xf32>
    %162 = arith.addf %161, %120 : vector<8x2xf32>
    %163 = vector.shape_cast %130 : vector<1x2xi1> to vector<1x2xi1>
    %164 = vector.broadcast %163 : vector<1x2xi1> to vector<8x2xi1>
    %165 = arith.select %164, %162, %117 : vector<8x2xi1>, vector<8x2xf32>
    %c4_i32 = arith.constant 4 : i32
    %166 = arith.index_cast %c4_i32 : i32 to index
    %c0_45 = arith.constant 0 : index
    %c0_46 = arith.constant 0 : index
    %167 = vector.load %arg1[%166, %c0_45, %c0_46] : memref<8x8x2xf32, #tpu.memory_space<vmem>>, vector<1x8x2xf32>
    %168 = vector.shape_cast %167 : vector<1x8x2xf32> to vector<8x2xf32>
    %169 = arith.index_cast %c4_i32 : i32 to index
    %c0_47 = arith.constant 0 : index
    %170 = vector.load %arg2[%169, %c0_47] : memref<8x2xi32, #tpu.memory_space<vmem>>, vector<1x2xi32>
    %171 = arith.index_cast %c4_i32 : i32 to index
    %c0_48 = arith.constant 0 : index
    %172 = vector.load %arg3[%171, %c0_48] : memref<8x2xf32, #tpu.memory_space<vmem>>, vector<1x2xf32>
    %173 = vector.broadcast %170 : vector<1x2xi32> to vector<8x2xi32>
    %174 = arith.cmpi eq, %3, %173 : vector<8x2xi32>
    %175 = arith.extui %174 : vector<8x2xi1> to vector<8x2xi32>
    %176 = arith.sitofp %175 : vector<8x2xi32> to vector<8x2xf32>
    %cst_49 = arith.constant 5.000000e-01 : f32
    %177 = vector.broadcast %cst_49 : f32 to vector<1x2xf32>
    %178 = arith.cmpf ogt, %172, %177 : vector<1x2xf32>
    %179 = arith.mulf %176, %168 : vector<8x2xf32>
    %cst_50 = arith.constant dense<0.000000e+00> : vector<2xf32>
    %180 = vector.multi_reduction <add>, %179, %cst_50 [0] : vector<8x2xf32> to vector<2xf32>
    %181 = vector.shape_cast %180 : vector<2xf32> to vector<1x2xf32>
    %182 = vector.shape_cast %176 : vector<8x2xf32> to vector<1x8x2xf32>
    %183 = vector.broadcast %2 : vector<8x8x1xf32> to vector<8x8x2xf32>
    %184 = vector.broadcast %182 : vector<1x8x2xf32> to vector<8x8x2xf32>
    %185 = arith.mulf %183, %184 : vector<8x8x2xf32>
    %cst_51 = arith.constant dense<0.000000e+00> : vector<8x2xf32>
    %186 = vector.multi_reduction <add>, %185, %cst_51 [1] : vector<8x8x2xf32> to vector<8x2xf32>
    %187 = arith.mulf %128, %186 : vector<8x2xf32>
    %cst_52 = arith.constant dense<0.000000e+00> : vector<2xf32>
    %188 = vector.multi_reduction <add>, %187, %cst_52 [0] : vector<8x2xf32> to vector<2xf32>
    %189 = vector.shape_cast %188 : vector<2xf32> to vector<1x2xf32>
    %190 = arith.addf %189, %181 : vector<1x2xf32>
    %191 = arith.mulf %172, %190 : vector<1x2xf32>
    %192 = arith.addf %144, %191 : vector<1x2xf32>
    %193 = vector.broadcast %1 : vector<8x1xf32> to vector<8x2xf32>
    %194 = arith.mulf %176, %193 : vector<8x2xf32>
    %cst_53 = arith.constant dense<0.000000e+00> : vector<2xf32>
    %195 = vector.multi_reduction <add>, %194, %cst_53 [0] : vector<8x2xf32> to vector<2xf32>
    %196 = vector.shape_cast %195 : vector<2xf32> to vector<1x2xf32>
    %197 = arith.select %178, %196, %149 : vector<1x2xi1>, vector<1x2xf32>
    %198 = vector.shape_cast %165 : vector<8x2xf32> to vector<8x1x2xf32>
    %199 = vector.broadcast %198 : vector<8x1x2xf32> to vector<8x8x2xf32>
    %200 = vector.broadcast %2 : vector<8x8x1xf32> to vector<8x8x2xf32>
    %201 = arith.addf %199, %200 : vector<8x8x2xf32>
    %cst_54 = arith.constant dense<0xFF800000> : vector<8x2xf32>
    %202 = vector.multi_reduction <maximumf>, %201, %cst_54 [0] : vector<8x8x2xf32> to vector<8x2xf32>
    %203 = vector.shape_cast %202 : vector<8x2xf32> to vector<1x8x2xf32>
    %204 = vector.broadcast %203 : vector<1x8x2xf32> to vector<8x8x2xf32>
    %205 = arith.subf %201, %204 : vector<8x8x2xf32>
    %206 = math.exp %205 : vector<8x8x2xf32>
    %cst_55 = arith.constant dense<0.000000e+00> : vector<8x2xf32>
    %207 = vector.multi_reduction <add>, %206, %cst_55 [0] : vector<8x8x2xf32> to vector<8x2xf32>
    %208 = math.log %207 : vector<8x2xf32>
    %209 = arith.addf %202, %208 : vector<8x2xf32>
    %210 = arith.addf %209, %168 : vector<8x2xf32>
    %211 = vector.shape_cast %178 : vector<1x2xi1> to vector<1x2xi1>
    %212 = vector.broadcast %211 : vector<1x2xi1> to vector<8x2xi1>
    %213 = arith.select %212, %210, %165 : vector<8x2xi1>, vector<8x2xf32>
    %c5_i32 = arith.constant 5 : i32
    %214 = arith.index_cast %c5_i32 : i32 to index
    %c0_56 = arith.constant 0 : index
    %c0_57 = arith.constant 0 : index
    %215 = vector.load %arg1[%214, %c0_56, %c0_57] : memref<8x8x2xf32, #tpu.memory_space<vmem>>, vector<1x8x2xf32>
    %216 = vector.shape_cast %215 : vector<1x8x2xf32> to vector<8x2xf32>
    %217 = arith.index_cast %c5_i32 : i32 to index
    %c0_58 = arith.constant 0 : index
    %218 = vector.load %arg2[%217, %c0_58] : memref<8x2xi32, #tpu.memory_space<vmem>>, vector<1x2xi32>
    %219 = arith.index_cast %c5_i32 : i32 to index
    %c0_59 = arith.constant 0 : index
    %220 = vector.load %arg3[%219, %c0_59] : memref<8x2xf32, #tpu.memory_space<vmem>>, vector<1x2xf32>
    %221 = vector.broadcast %218 : vector<1x2xi32> to vector<8x2xi32>
    %222 = arith.cmpi eq, %3, %221 : vector<8x2xi32>
    %223 = arith.extui %222 : vector<8x2xi1> to vector<8x2xi32>
    %224 = arith.sitofp %223 : vector<8x2xi32> to vector<8x2xf32>
    %cst_60 = arith.constant 5.000000e-01 : f32
    %225 = vector.broadcast %cst_60 : f32 to vector<1x2xf32>
    %226 = arith.cmpf ogt, %220, %225 : vector<1x2xf32>
    %227 = arith.mulf %224, %216 : vector<8x2xf32>
    %cst_61 = arith.constant dense<0.000000e+00> : vector<2xf32>
    %228 = vector.multi_reduction <add>, %227, %cst_61 [0] : vector<8x2xf32> to vector<2xf32>
    %229 = vector.shape_cast %228 : vector<2xf32> to vector<1x2xf32>
    %230 = vector.shape_cast %224 : vector<8x2xf32> to vector<1x8x2xf32>
    %231 = vector.broadcast %2 : vector<8x8x1xf32> to vector<8x8x2xf32>
    %232 = vector.broadcast %230 : vector<1x8x2xf32> to vector<8x8x2xf32>
    %233 = arith.mulf %231, %232 : vector<8x8x2xf32>
    %cst_62 = arith.constant dense<0.000000e+00> : vector<8x2xf32>
    %234 = vector.multi_reduction <add>, %233, %cst_62 [1] : vector<8x8x2xf32> to vector<8x2xf32>
    %235 = arith.mulf %176, %234 : vector<8x2xf32>
    %cst_63 = arith.constant dense<0.000000e+00> : vector<2xf32>
    %236 = vector.multi_reduction <add>, %235, %cst_63 [0] : vector<8x2xf32> to vector<2xf32>
    %237 = vector.shape_cast %236 : vector<2xf32> to vector<1x2xf32>
    %238 = arith.addf %237, %229 : vector<1x2xf32>
    %239 = arith.mulf %220, %238 : vector<1x2xf32>
    %240 = arith.addf %192, %239 : vector<1x2xf32>
    %241 = vector.broadcast %1 : vector<8x1xf32> to vector<8x2xf32>
    %242 = arith.mulf %224, %241 : vector<8x2xf32>
    %cst_64 = arith.constant dense<0.000000e+00> : vector<2xf32>
    %243 = vector.multi_reduction <add>, %242, %cst_64 [0] : vector<8x2xf32> to vector<2xf32>
    %244 = vector.shape_cast %243 : vector<2xf32> to vector<1x2xf32>
    %245 = arith.select %226, %244, %197 : vector<1x2xi1>, vector<1x2xf32>
    %246 = vector.shape_cast %213 : vector<8x2xf32> to vector<8x1x2xf32>
    %247 = vector.broadcast %246 : vector<8x1x2xf32> to vector<8x8x2xf32>
    %248 = vector.broadcast %2 : vector<8x8x1xf32> to vector<8x8x2xf32>
    %249 = arith.addf %247, %248 : vector<8x8x2xf32>
    %cst_65 = arith.constant dense<0xFF800000> : vector<8x2xf32>
    %250 = vector.multi_reduction <maximumf>, %249, %cst_65 [0] : vector<8x8x2xf32> to vector<8x2xf32>
    %251 = vector.shape_cast %250 : vector<8x2xf32> to vector<1x8x2xf32>
    %252 = vector.broadcast %251 : vector<1x8x2xf32> to vector<8x8x2xf32>
    %253 = arith.subf %249, %252 : vector<8x8x2xf32>
    %254 = math.exp %253 : vector<8x8x2xf32>
    %cst_66 = arith.constant dense<0.000000e+00> : vector<8x2xf32>
    %255 = vector.multi_reduction <add>, %254, %cst_66 [0] : vector<8x8x2xf32> to vector<8x2xf32>
    %256 = math.log %255 : vector<8x2xf32>
    %257 = arith.addf %250, %256 : vector<8x2xf32>
    %258 = arith.addf %257, %216 : vector<8x2xf32>
    %259 = vector.shape_cast %226 : vector<1x2xi1> to vector<1x2xi1>
    %260 = vector.broadcast %259 : vector<1x2xi1> to vector<8x2xi1>
    %261 = arith.select %260, %258, %213 : vector<8x2xi1>, vector<8x2xf32>
    %c6_i32 = arith.constant 6 : i32
    %262 = arith.index_cast %c6_i32 : i32 to index
    %c0_67 = arith.constant 0 : index
    %c0_68 = arith.constant 0 : index
    %263 = vector.load %arg1[%262, %c0_67, %c0_68] : memref<8x8x2xf32, #tpu.memory_space<vmem>>, vector<1x8x2xf32>
    %264 = vector.shape_cast %263 : vector<1x8x2xf32> to vector<8x2xf32>
    %265 = arith.index_cast %c6_i32 : i32 to index
    %c0_69 = arith.constant 0 : index
    %266 = vector.load %arg2[%265, %c0_69] : memref<8x2xi32, #tpu.memory_space<vmem>>, vector<1x2xi32>
    %267 = arith.index_cast %c6_i32 : i32 to index
    %c0_70 = arith.constant 0 : index
    %268 = vector.load %arg3[%267, %c0_70] : memref<8x2xf32, #tpu.memory_space<vmem>>, vector<1x2xf32>
    %269 = vector.broadcast %266 : vector<1x2xi32> to vector<8x2xi32>
    %270 = arith.cmpi eq, %3, %269 : vector<8x2xi32>
    %271 = arith.extui %270 : vector<8x2xi1> to vector<8x2xi32>
    %272 = arith.sitofp %271 : vector<8x2xi32> to vector<8x2xf32>
    %cst_71 = arith.constant 5.000000e-01 : f32
    %273 = vector.broadcast %cst_71 : f32 to vector<1x2xf32>
    %274 = arith.cmpf ogt, %268, %273 : vector<1x2xf32>
    %275 = arith.mulf %272, %264 : vector<8x2xf32>
    %cst_72 = arith.constant dense<0.000000e+00> : vector<2xf32>
    %276 = vector.multi_reduction <add>, %275, %cst_72 [0] : vector<8x2xf32> to vector<2xf32>
    %277 = vector.shape_cast %276 : vector<2xf32> to vector<1x2xf32>
    %278 = vector.shape_cast %272 : vector<8x2xf32> to vector<1x8x2xf32>
    %279 = vector.broadcast %2 : vector<8x8x1xf32> to vector<8x8x2xf32>
    %280 = vector.broadcast %278 : vector<1x8x2xf32> to vector<8x8x2xf32>
    %281 = arith.mulf %279, %280 : vector<8x8x2xf32>
    %cst_73 = arith.constant dense<0.000000e+00> : vector<8x2xf32>
    %282 = vector.multi_reduction <add>, %281, %cst_73 [1] : vector<8x8x2xf32> to vector<8x2xf32>
    %283 = arith.mulf %224, %282 : vector<8x2xf32>
    %cst_74 = arith.constant dense<0.000000e+00> : vector<2xf32>
    %284 = vector.multi_reduction <add>, %283, %cst_74 [0] : vector<8x2xf32> to vector<2xf32>
    %285 = vector.shape_cast %284 : vector<2xf32> to vector<1x2xf32>
    %286 = arith.addf %285, %277 : vector<1x2xf32>
    %287 = arith.mulf %268, %286 : vector<1x2xf32>
    %288 = arith.addf %240, %287 : vector<1x2xf32>
    %289 = vector.broadcast %1 : vector<8x1xf32> to vector<8x2xf32>
    %290 = arith.mulf %272, %289 : vector<8x2xf32>
    %cst_75 = arith.constant dense<0.000000e+00> : vector<2xf32>
    %291 = vector.multi_reduction <add>, %290, %cst_75 [0] : vector<8x2xf32> to vector<2xf32>
    %292 = vector.shape_cast %291 : vector<2xf32> to vector<1x2xf32>
    %293 = arith.select %274, %292, %245 : vector<1x2xi1>, vector<1x2xf32>
    %294 = vector.shape_cast %261 : vector<8x2xf32> to vector<8x1x2xf32>
    %295 = vector.broadcast %294 : vector<8x1x2xf32> to vector<8x8x2xf32>
    %296 = vector.broadcast %2 : vector<8x8x1xf32> to vector<8x8x2xf32>
    %297 = arith.addf %295, %296 : vector<8x8x2xf32>
    %cst_76 = arith.constant dense<0xFF800000> : vector<8x2xf32>
    %298 = vector.multi_reduction <maximumf>, %297, %cst_76 [0] : vector<8x8x2xf32> to vector<8x2xf32>
    %299 = vector.shape_cast %298 : vector<8x2xf32> to vector<1x8x2xf32>
    %300 = vector.broadcast %299 : vector<1x8x2xf32> to vector<8x8x2xf32>
    %301 = arith.subf %297, %300 : vector<8x8x2xf32>
    %302 = math.exp %301 : vector<8x8x2xf32>
    %cst_77 = arith.constant dense<0.000000e+00> : vector<8x2xf32>
    %303 = vector.multi_reduction <add>, %302, %cst_77 [0] : vector<8x8x2xf32> to vector<8x2xf32>
    %304 = math.log %303 : vector<8x2xf32>
    %305 = arith.addf %298, %304 : vector<8x2xf32>
    %306 = arith.addf %305, %264 : vector<8x2xf32>
    %307 = vector.shape_cast %274 : vector<1x2xi1> to vector<1x2xi1>
    %308 = vector.broadcast %307 : vector<1x2xi1> to vector<8x2xi1>
    %309 = arith.select %308, %306, %261 : vector<8x2xi1>, vector<8x2xf32>
    %c7_i32 = arith.constant 7 : i32
    %310 = arith.index_cast %c7_i32 : i32 to index
    %c0_78 = arith.constant 0 : index
    %c0_79 = arith.constant 0 : index
    %311 = vector.load %arg1[%310, %c0_78, %c0_79] : memref<8x8x2xf32, #tpu.memory_space<vmem>>, vector<1x8x2xf32>
    %312 = vector.shape_cast %311 : vector<1x8x2xf32> to vector<8x2xf32>
    %313 = arith.index_cast %c7_i32 : i32 to index
    %c0_80 = arith.constant 0 : index
    %314 = vector.load %arg2[%313, %c0_80] : memref<8x2xi32, #tpu.memory_space<vmem>>, vector<1x2xi32>
    %315 = arith.index_cast %c7_i32 : i32 to index
    %c0_81 = arith.constant 0 : index
    %316 = vector.load %arg3[%315, %c0_81] : memref<8x2xf32, #tpu.memory_space<vmem>>, vector<1x2xf32>
    %317 = vector.broadcast %314 : vector<1x2xi32> to vector<8x2xi32>
    %318 = arith.cmpi eq, %3, %317 : vector<8x2xi32>
    %319 = arith.extui %318 : vector<8x2xi1> to vector<8x2xi32>
    %320 = arith.sitofp %319 : vector<8x2xi32> to vector<8x2xf32>
    %cst_82 = arith.constant 5.000000e-01 : f32
    %321 = vector.broadcast %cst_82 : f32 to vector<1x2xf32>
    %322 = arith.cmpf ogt, %316, %321 : vector<1x2xf32>
    %323 = arith.mulf %320, %312 : vector<8x2xf32>
    %cst_83 = arith.constant dense<0.000000e+00> : vector<2xf32>
    %324 = vector.multi_reduction <add>, %323, %cst_83 [0] : vector<8x2xf32> to vector<2xf32>
    %325 = vector.shape_cast %324 : vector<2xf32> to vector<1x2xf32>
    %326 = vector.shape_cast %320 : vector<8x2xf32> to vector<1x8x2xf32>
    %327 = vector.broadcast %2 : vector<8x8x1xf32> to vector<8x8x2xf32>
    %328 = vector.broadcast %326 : vector<1x8x2xf32> to vector<8x8x2xf32>
    %329 = arith.mulf %327, %328 : vector<8x8x2xf32>
    %cst_84 = arith.constant dense<0.000000e+00> : vector<8x2xf32>
    %330 = vector.multi_reduction <add>, %329, %cst_84 [1] : vector<8x8x2xf32> to vector<8x2xf32>
    %331 = arith.mulf %272, %330 : vector<8x2xf32>
    %cst_85 = arith.constant dense<0.000000e+00> : vector<2xf32>
    %332 = vector.multi_reduction <add>, %331, %cst_85 [0] : vector<8x2xf32> to vector<2xf32>
    %333 = vector.shape_cast %332 : vector<2xf32> to vector<1x2xf32>
    %334 = arith.addf %333, %325 : vector<1x2xf32>
    %335 = arith.mulf %316, %334 : vector<1x2xf32>
    %336 = arith.addf %288, %335 : vector<1x2xf32>
    %337 = vector.broadcast %1 : vector<8x1xf32> to vector<8x2xf32>
    %338 = arith.mulf %320, %337 : vector<8x2xf32>
    %cst_86 = arith.constant dense<0.000000e+00> : vector<2xf32>
    %339 = vector.multi_reduction <add>, %338, %cst_86 [0] : vector<8x2xf32> to vector<2xf32>
    %340 = vector.shape_cast %339 : vector<2xf32> to vector<1x2xf32>
    %341 = arith.select %322, %340, %293 : vector<1x2xi1>, vector<1x2xf32>
    %342 = vector.shape_cast %309 : vector<8x2xf32> to vector<8x1x2xf32>
    %343 = vector.broadcast %342 : vector<8x1x2xf32> to vector<8x8x2xf32>
    %344 = vector.broadcast %2 : vector<8x8x1xf32> to vector<8x8x2xf32>
    %345 = arith.addf %343, %344 : vector<8x8x2xf32>
    %cst_87 = arith.constant dense<0xFF800000> : vector<8x2xf32>
    %346 = vector.multi_reduction <maximumf>, %345, %cst_87 [0] : vector<8x8x2xf32> to vector<8x2xf32>
    %347 = vector.shape_cast %346 : vector<8x2xf32> to vector<1x8x2xf32>
    %348 = vector.broadcast %347 : vector<1x8x2xf32> to vector<8x8x2xf32>
    %349 = arith.subf %345, %348 : vector<8x8x2xf32>
    %350 = math.exp %349 : vector<8x8x2xf32>
    %cst_88 = arith.constant dense<0.000000e+00> : vector<8x2xf32>
    %351 = vector.multi_reduction <add>, %350, %cst_88 [0] : vector<8x8x2xf32> to vector<8x2xf32>
    %352 = math.log %351 : vector<8x2xf32>
    %353 = arith.addf %346, %352 : vector<8x2xf32>
    %354 = arith.addf %353, %312 : vector<8x2xf32>
    %355 = vector.shape_cast %322 : vector<1x2xi1> to vector<1x2xi1>
    %356 = vector.broadcast %355 : vector<1x2xi1> to vector<8x2xi1>
    %357 = arith.select %356, %354, %309 : vector<8x2xi1>, vector<8x2xf32>
    %c7_i32_89 = arith.constant 7 : i32
    %358 = vector.broadcast %1 : vector<8x1xf32> to vector<8x2xf32>
    %359 = arith.addf %357, %358 : vector<8x2xf32>
    %cst_90 = arith.constant dense<0xFF800000> : vector<2xf32>
    %360 = vector.multi_reduction <maximumf>, %359, %cst_90 [0] : vector<8x2xf32> to vector<2xf32>
    %361 = vector.shape_cast %360 : vector<2xf32> to vector<1x2xf32>
    %362 = vector.broadcast %361 : vector<1x2xf32> to vector<8x2xf32>
    %363 = arith.subf %359, %362 : vector<8x2xf32>
    %364 = math.exp %363 : vector<8x2xf32>
    %cst_91 = arith.constant dense<0.000000e+00> : vector<2xf32>
    %365 = vector.multi_reduction <add>, %364, %cst_91 [0] : vector<8x2xf32> to vector<2xf32>
    %366 = vector.shape_cast %365 : vector<2xf32> to vector<1x2xf32>
    %367 = math.log %366 : vector<1x2xf32>
    %368 = arith.addf %361, %367 : vector<1x2xf32>
    %369 = arith.addf %336, %341 : vector<1x2xf32>
    %370 = arith.subf %369, %368 : vector<1x2xf32>
    %c0_92 = arith.constant 0 : index
    %c0_93 = arith.constant 0 : index
    %371 = vector.load %arg8[%c0_92, %c0_93] : memref<1x2xf32, #tpu.memory_space<vmem>>, vector<1x2xf32>
    tpu.vector_store %arg8[%c0_92, %c0_93], %370 {strides = array<i32>} : memref<1x2xf32, #tpu.memory_space<vmem>>, vector<1x2xf32>,
    %c0_94 = arith.constant 0 : index
    %c0_95 = arith.constant 0 : index
    %372 = vector.load %arg3[%c0_94, %c0_95] : memref<8x2xf32, #tpu.memory_space<vmem>>, vector<8x2xf32>
    %cst_96 = arith.constant dense<0.000000e+00> : vector<2xf32>
    %373 = vector.multi_reduction <add>, %372, %cst_96 [0] : vector<8x2xf32> to vector<2xf32>
    %374 = vector.shape_cast %373 : vector<2xf32> to vector<1x2xf32>
    %c0_97 = arith.constant 0 : index
    %c0_98 = arith.constant 0 : index
    %375 = vector.load %arg9[%c0_97, %c0_98] : memref<1x2xf32, #tpu.memory_space<vmem>>, vector<1x2xf32>
    tpu.vector_store %arg9[%c0_97, %c0_98], %374 {strides = array<i32>} : memref<1x2xf32, #tpu.memory_space<vmem>>, vector<1x2xf32>,
    return
  }
  func.func @transform_0(%arg0: i32) -> (i32, i32, i32) {
    %c0_i32 = arith.constant 0 : i32
    %c0_i32_0 = arith.constant 0 : i32
    %c0_i32_1 = arith.constant 0 : i32
    return %c0_i32, %c0_i32_0, %arg0 : i32, i32, i32
  }
  func.func @transform_1(%arg0: i32) -> (i32, i32) {
    %c0_i32 = arith.constant 0 : i32
    %c0_i32_0 = arith.constant 0 : i32
    return %c0_i32, %arg0 : i32, i32
  }
  func.func @transform_2(%arg0: i32) -> (i32, i32) {
    %c0_i32 = arith.constant 0 : i32
    %c0_i32_0 = arith.constant 0 : i32
    return %c0_i32, %arg0 : i32, i32
  }
  func.func @transform_3(%arg0: i32) -> (i32, i32) {
    %c0_i32 = arith.constant 0 : i32
    %c0_i32_0 = arith.constant 0 : i32
    %c0_i32_1 = arith.constant 0 : i32
    return %c0_i32, %c0_i32_0 : i32, i32
  }
  func.func @transform_4(%arg0: i32) -> (i32, i32) {
    %c0_i32 = arith.constant 0 : i32
    %c0_i32_0 = arith.constant 0 : i32
    %c0_i32_1 = arith.constant 0 : i32
    return %c0_i32, %c0_i32_0 : i32, i32
  }
  func.func @transform_5(%arg0: i32) -> (i32, i32) {
    %c0_i32 = arith.constant 0 : i32
    %c0_i32_0 = arith.constant 0 : i32
    %c0_i32_1 = arith.constant 0 : i32
    return %c0_i32, %c0_i32_0 : i32, i32
  }
  func.func @transform_6(%arg0: i32) -> (i32, i32, i32) {
    %c0_i32 = arith.constant 0 : i32
    %c0_i32_0 = arith.constant 0 : i32
    %c0_i32_1 = arith.constant 0 : i32
    %c0_i32_2 = arith.constant 0 : i32
    return %c0_i32, %c0_i32_0, %c0_i32_1 : i32, i32, i32
  }
  func.func @transform_7(%arg0: i32) -> (i32, i32) {
    %c0_i32 = arith.constant 0 : i32
    %c0_i32_0 = arith.constant 0 : i32
    return %c0_i32, %arg0 : i32, i32
  }
  func.func @transform_8(%arg0: i32) -> (i32, i32) {
    %c0_i32 = arith.constant 0 : i32
    %c0_i32_0 = arith.constant 0 : i32
    return %c0_i32, %arg0 : i32, i32
  }
}

</mosaic_0001>

<bundles_post_ra>
// kernel: tpu_custom_call.1
= control target key start
LH: loop header
LB: loop body
LE: loop exit
PB: predicated region body
PF: predicated region fallthrough
CT: control target
= control target key end

     0   :  { %14 = vsyncpa [#allocation3], 0  ;;  %v3030_v2 = vmov 0   ;;  %s3019_s0 = inlined_call_operand.vmem [shape: f32[8,8,2], index: 0, kind: input, shape index: {}]   ;;  %s3020_s1 = inlined_call_operand.vmem [shape: s32[8,2], index: 1, kind: input, shape index: {}]   ;;  %s3021_s2 = inlined_call_operand.vmem [shape: f32[8,2], index: 2, kind: input, shape index: {}]   ;;  %s3022_s3 = inlined_call_operand.vmem [shape: f32[8,1], index: 3, kind: input, shape index: {}]   ;;  %s3023_s4 = inlined_call_operand.vmem [shape: f32[8,1], index: 4, kind: input, shape index: {}]   ;;  %s3024_s5 = inlined_call_operand.vmem [shape: f32[8,8], index: 5, kind: input, shape index: {}]   ;;  %s3025_s6 = inlined_call_operand.vmem [shape: f32[8,8,1], index: 6, kind: input, shape index: {}]   ;;  %s3026_s7 = inlined_call_operand.hbm [shape: f32[1,2], index: 7, kind: output, shape index: {0}]   ;;  %s3027_s8 = inlined_call_operand.hbm [shape: f32[1,2], index: 8, kind: output, shape index: {1}]  }
   0x1   :  { %v33_v0 = vld [vmem:[%s3025_s6 + $0x8] sm:$0xff]  ;;  %v30_v1 = vld [vmem:[%s3022_s3] sm:$0xff]  ;;  %1686 = vset.pattern.permute.xlu1 %v3030_v2  ;;  %1685 = vset.pattern.permute.xlu0 %v3030_v2  ;;  %v35_v3 = vld [vmem:[%s3025_s6 + $0x18] sm:$0xff] }
   0x2   :  { %100 = vperm.xlu1 %1686, %v33_v0   ;;  %50 = vperm.xlu0 %1685, %v30_v1  }
   0x3   :  { %1687 = vset.pattern.permute.xlu2 %v3030_v2 }
   0x4   :  { %110 = vperm.xlu2 %1687, %v35_v3  }
   0x5   :  { %15 = vsyncpa [#allocation5], 0  ;;  %v34_v4 = vld [vmem:[%s3025_s6 + $0x10] sm:$0xff]  ;;  %v32_v5 = vld [vmem:[%s3025_s6] sm:$0xff]  ;;  %v40_v11 = vlaneseq  ;;  %v3028_v14 = vmov 0.0   ;;  %vm55_vm1 = vcmask 15360  }
   0x6   :  { %v36_v6 = vld [vmem:[%s3025_s6 + $0x20] sm:$0xff]  ;;  %v38_v7 = vld [vmem:[%s3025_s6 + $0x30] sm:$0xff]  ;;  %v37_v8 = vld [vmem:[%s3025_s6 + $0x28] sm:$0xff]  ;;  %vm205_vm6 = vcmask 1041409   ;;  %vm207_vm7 = vcmask 1042434   ;;  %vm209_vm8 = vcmask 1043459  }
   0x7   :  { %v39_v9 = vld [vmem:[%s3025_s6 + $0x38] sm:$0xff]  ;;  %v31_v10 = vld [vmem:[%s3023_s4] sm:$0xff]  ;;  %v1963_v12 = vshrl.u32 %v40_v11, 7  ;;  %vm211_vm9 = vcmask 1044484   ;;  %vm213_vm10 = vcmask 1045509   ;;  %vm215_vm11 = vcmask 1046534  }
   0x8   :  { %v1689_v13 = vld [vmem:[%s3020_s1 + $0x1] ss:$0 sm:$0xff]  ;;  %v1690_v28 = vld [vmem:[%s3020_s1 + $0x2] ss:$0 sm:$0xff]  ;;  %v1688_v30 = vld [vmem:[%s3020_s1] ss:$0 sm:$0xff] }
   0x9   :  { %3037 = vst [vmem:[#allocation8_spill] sm:$0xff] %v1963_v12  ;;  %vm81_vm0 = vcmp.eq.s32.totalorder %v1963_v12, %v1689_v13  ;;  %v1691_v32 = vld [vmem:[%s3020_s1 + $0x3] ss:$0 sm:$0xff]  ;;  %v1692_v35 = vld [vmem:[%s3020_s1 + $0x4] ss:$0 sm:$0xff]  ;;  %vm339_vm2 = vcmp.eq.s32.totalorder %v1963_v12, %v1690_v28  ;;  %vm45_vm3 = vcmp.eq.s32.totalorder %v1963_v12, %v1688_v30  ;;  %vm217_vm12 = vcmask 1047559  }
   0xa   :  { %105 = vperm.xlu1 %1686, %v34_v4   ;;  %95 = vperm.xlu0 %1685, %v32_v5   ;;  %v1970_v15 = vsel %vm81_vm0, 1.0, %v3028_v14  ;;  %v42_v36 = vld [vmem:[%s3019_s0] sm:$0xff]  ;;  %vm550_vm4 = vcmp.eq.s32.totalorder %v1963_v12, %v1691_v32  ;;  %v2010_v43 = vsel %vm339_vm2, 1.0, %v3028_v14  ;;  %vm761_vm5 = vcmp.eq.s32.totalorder %v1963_v12, %v1692_v35  ;;  %s1883_s23 = smov [#allocation4]   ;;  %s1652_s25 = sshll.u32 %s3027_s8, 4  ;;  %s1653_s25 = int_to_ptr.hbm [resolvable:$true] %s1652_s25 }
   0xb   :  { %v2018_v47 = vsel %vm45_vm3, 1.0, %v3028_v14  ;;  %v2021_v48 = vsel %vm550_vm4, 1.0, %v3028_v14  ;;  %v2024_v51 = vsel %vm761_vm5, 1.0, %v3028_v14  ;;  %s1650_s24 = sshll.u32 %s1883_s23, 4  ;;  %s1641_s8 = sshll.u32 %s3026_s7, 4  ;;  %s1651_s24 = int_to_ptr.vmem [resolvable:$true] %s1650_s24  ;;  %s1642_s8 = int_to_ptr.hbm [resolvable:$true] %s1641_s8 }
   0xc   :  { %115 = vperm.xlu2 %1687, %v36_v6  }
  0x12   :  { %125 = vperm.xlu1 %1686, %v38_v7   ;;  %120 = vperm.xlu0 %1685, %v37_v8  }
  0x14   :  { %130 = vperm.xlu2 %1687, %v39_v9  }
  0x1a   :  { %65 = vperm.xlu0 %1685, %v31_v10  }
  0x5e   :  { %v1972_v16 = vpop.permute.xlu2 %110 }
  0x5f   :  { %v136_v17 = vmul.f32 %v1970_v15, %v1972_v16  ;;  %v2028_v52 = vmul.f32 %v2010_v43, %v1972_v16 }
  0x61   :  { %v162_v18 = vsel %vm55_vm1, %v136_v17, 0.0 }
  0x62   :  { %v163_v19 = vrot.slane %v162_v18, 4 }
  0x64   :  { %v164_v22 = vadd.f32 %v163_v19, %v162_v18 }
  0x66   :  { %v1977_v20 = vpop.permute.xlu2 %115  ;;  %v165_v26 = vrot.slane %v164_v22, 2 }
  0x67   :  { %v137_v21 = vmul.f32 %v1970_v15, %v1977_v20  ;;  %v2036_v56 = vmul.f32 %v2010_v43, %v1977_v20 }
  0x68   :  { %v166_v33 = vadd.f32 %v165_v26, %v164_v22 }
  0x69   :  { %v169_v23 = vsel %vm55_vm1, %v137_v21, 0.0 }
  0x6a   :  { %v170_v24 = vrot.slane %v169_v23, 4  ;;  %v167_v42 = vrot.slane %v166_v33, 1 }
  0x6c   :  { %v171_v25 = vadd.f32 %v170_v24, %v169_v23  ;;  %v2032_v55 = vadd.f32 %v167_v42, %v166_v33  ;;  %v2071_v24 = vld [vmem:[%s3019_s0 + $0x8] sm:$0xff] }
  0x6e   :  { %v1982_v27 = vpop.permute.xlu2 %130  ;;  %v172_v31 = vrot.slane %v171_v25, 2 }
  0x6f   :  { %3038 = vst [vmem:[#allocation9_spill] sm:$0xff] %v1982_v27  ;;  %v140_v29 = vmul.f32 %v1970_v15, %v1982_v27  ;;  %v2044_v60 = vmul.f32 %v2010_v43, %v1982_v27 }
  0x70   :  { %v173_v39 = vadd.f32 %v172_v31, %v171_v25 }
  0x71   :  { %v190_v34 = vsel %vm55_vm1, %v140_v29, 0.0 }
  0x72   :  { %v191_v40 = vrot.slane %v190_v34, 4  ;;  %v174_v49 = vrot.slane %v173_v39, 1 }
  0x74   :  { %v2003_v37 = vpop.permute.xlu1 %100  ;;  %v51_v38 = vpop.permute.xlu0 %50  ;;  %v192_v50 = vadd.f32 %v191_v40, %v190_v34  ;;  %v2052_v5 = vadd.f32 %v174_v49, %v173_v39  ;;  %v85_v39 = vmul.f32 %v1970_v15, %v2071_v24 }
  0x75   :  { %v2007_v41 = vadd.f32 %v51_v38, %v42_v36  ;;  %v134_v44 = vmul.f32 %v1970_v15, %v2003_v37  ;;  %v352_v7 = vmul.f32 %v2010_v43, %v2003_v37 }
  0x76   :  { %v193_v6 = vrot.slane %v192_v50, 2 }
  0x77   :  { %3039 = vst [vmem:[#allocation10_spill] sm:$0xff] %v2007_v41  ;;  %v241_v45 = vrot.slane %v2007_v41, 1  ;;  %v244_v46 = vrot.slane %v2007_v41, 4  ;;  %v242_v53 = vrot.slane %v2007_v41, 2  ;;  %v243_v54 = vrot.slane %v2007_v41, 3 }
  0x78   :  { %v245_v57 = vrot.slane %v2007_v41, 5  ;;  %v54_v58 = vmul.f32 %v2018_v47, %v2007_v41  ;;  %v148_v59 = vsel %vm55_vm1, %v134_v44, 0.0  ;;  %v247_v61 = vrot.slane %v2007_v41, 7 }
  0x79   :  { %v249_v62 = vperm.slane %v241_v45, 0  ;;  %v252_v63 = vperm.slane %v244_v46, 0  ;;  %v149_v0 = vrot.slane %v148_v59, 4  ;;  %v246_v8 = vrot.slane %v2007_v41, 6 }
  0x7a   :  { %v56_v4 = vsel %vm55_vm1, %v54_v58, 0.0  ;;  %v248_v9 = vperm.slane %v2007_v41, 0  ;;  %v250_v10 = vperm.slane %v242_v53, 0  ;;  %v251_v11 = vperm.slane %v243_v54, 0 }
  0x7b   :  { %v57_v13 = vrot.slane %v56_v4, 4  ;;  %v150_v19 = vadd.f32 %v149_v0, %v148_v59  ;;  %v253_v21 = vperm.slane %v245_v57, 0  ;;  %v2063_v22 = vadd.f32 %v249_v62, %v2003_v37 }
  0x7c   :  { %v2047_v1 = vpop.permute.xlu1 %105  ;;  %v2049_v3 = vpop.permute.xlu0 %95  ;;  %v2066_v23 = vadd.f32 %v252_v63, %v1977_v20  ;;  %v255_v25 = vperm.slane %v247_v61, 0  ;;  %v2079_v31 = vadd.f32 %v251_v11, %v1972_v16  ;;  %v254_v32 = vperm.slane %v246_v8, 0 }
  0x7d   :  { %v133_v17 = vmul.f32 %v1970_v15, %v2049_v3  ;;  %v135_v18 = vmul.f32 %v1970_v15, %v2047_v1  ;;  %v2074_v26 = vadd.f32 %v248_v9, %v2049_v3  ;;  %v151_v29 = vrot.slane %v150_v19, 2 }
  0x7e   :  { %v2082_v35 = vadd.f32 %v250_v10, %v2047_v1  ;;  %v2084_v36 = vadd.f32 %v193_v6, %v192_v50  ;;  %v58_v38 = vadd.f32 %v57_v13, %v56_v4  ;;  %v2089_v45 = vsel %vm55_vm1, %v352_v7, 0.0 }
  0x7f   :  { %v141_v28 = vsel %vm55_vm1, %v133_v17, 0.0  ;;  %v155_v30 = vsel %vm55_vm1, %v135_v18, 0.0  ;;  %v152_v42 = vadd.f32 %v151_v29, %v150_v19  ;;  %v2093_v46 = vsel %vm55_vm1, %v2063_v22, -inf }
  0x80   :  { %v142_v33 = vrot.slane %v141_v28, 4  ;;  %v156_v34 = vrot.slane %v155_v30, 4  ;;  %v2097_v49 = vsel %vm55_vm1, %v2066_v23, -inf  ;;  %v2101_v50 = vsel %vm55_vm1, %v2074_v26, -inf }
  0x81   :  { %v2108_v57 = vadd.f32 %v255_v25, %v1982_v27  ;;  %v86_v62 = vsel %vm55_vm1, %v85_v39, 0.0  ;;  %v2117_v63 = vsel %vm55_vm1, %v2082_v35, -inf  ;;  %v195_v4 = vrot.slane %v2084_v36, 1 }
  0x82   :  { %v143_v40 = vadd.f32 %v142_v33, %v141_v28  ;;  %v157_v44 = vadd.f32 %v156_v34, %v155_v30  ;;  %v59_v6 = vrot.slane %v58_v38, 2  ;;  %v153_v8 = vrot.slane %v152_v42, 1 }
  0x83   :  { %v87_v18 = vrot.slane %v86_v62, 4  ;;  %v277_v19 = vmax.f32 %v2101_v50, %v2097_v49  ;;  %v275_v28 = vsel %vm55_vm1, %v2079_v31, -inf  ;;  %v282_v29 = vsel %vm55_vm1, %v2108_v57, -inf }
  0x84   :  { %v2103_v53 = vpop.permute.xlu1 %125  ;;  %v2105_v54 = vpop.permute.xlu0 %120  ;;  %v144_v61 = vrot.slane %v143_v40, 2  ;;  %v158_v0 = vrot.slane %v157_v44, 2  ;;  %v283_v27 = vmax.f32 %v275_v28, %v282_v29 }
  0x85   :  { %v138_v58 = vmul.f32 %v1970_v15, %v2105_v54  ;;  %v139_v59 = vmul.f32 %v1970_v15, %v2103_v53  ;;  %v2129_v30 = vadd.f32 %v254_v32, %v2103_v53  ;;  %v2132_v49 = vadd.f32 %v253_v21, %v2105_v54 }
  0x86   :  { %v145_v7 = vadd.f32 %v144_v61, %v143_v40  ;;  %v159_v11 = vadd.f32 %v158_v0, %v157_v44  ;;  %v154_v44 = vadd.f32 %v153_v8, %v152_v42  ;;  %v88_v14 = vadd.f32 %v87_v18, %v86_v62 }
  0x87   :  { %v176_v9 = vsel %vm55_vm1, %v138_v58, 0.0  ;;  %v183_v10 = vsel %vm55_vm1, %v139_v59, 0.0  ;;  %v60_v58 = vadd.f32 %v59_v6, %v58_v38  ;;  %v280_v21 = vsel %vm55_vm1, %v2129_v30, -inf }
  0x88   :  { %v177_v13 = vrot.slane %v176_v9, 4  ;;  %v184_v17 = vrot.slane %v183_v10, 4  ;;  %v146_v25 = vrot.slane %v145_v7, 1  ;;  %v160_v33 = vrot.slane %v159_v11, 1 }
  0x89   :  { %v61_v12 = vrot.slane %v60_v58, 1 }
  0x8a   :  { %v178_v34 = vadd.f32 %v177_v13, %v176_v9  ;;  %v185_v39 = vadd.f32 %v184_v17, %v183_v10  ;;  %v147_v40 = vadd.f32 %v146_v25, %v145_v7  ;;  %v161_v50 = vadd.f32 %v160_v33, %v159_v11 }
  0x8b   :  { %v278_v13 = vsel %vm55_vm1, %v2132_v49, -inf }
  0x8c   :  { %v179_v59 = vrot.slane %v178_v34, 2  ;;  %v186_v61 = vrot.slane %v185_v39, 2  ;;  %v2134_v0 = vpop.permute.xlu0 %65  ;;  %v206_v32 = vsel %vm205_vm6, %v154_v44, %v147_v40  ;;  %v89_v44 = vrot.slane %v88_v14, 2 }
  0x8d   :  { %v68_v9 = vmul.f32 %v2018_v47, %v2134_v0  ;;  %v231_v7 = vmul.f32 %v1970_v15, %v2134_v0  ;;  %v442_v38 = vmul.f32 %v2010_v43, %v2134_v0  ;;  %v208_v8 = vsel %vm207_vm7, %v161_v50, %v206_v32 }
  0x8e   :  { %v180_v42 = vadd.f32 %v179_v59, %v178_v34  ;;  %v187_v6 = vadd.f32 %v186_v61, %v185_v39  ;;  %v210_v25 = vsel %vm209_vm8, %v2032_v55, %v208_v8  ;;  %v653_v39 = vmul.f32 %v2021_v48, %v2134_v0 }
  0x8f   :  { %v69_v62 = vsel %vm55_vm1, %v68_v9, 0.0  ;;  %v232_v10 = vsel %vm55_vm1, %v231_v7, 0.0  ;;  %v443_v11 = vsel %vm55_vm1, %v442_v38, 0.0  ;;  %v279_v32 = vmax.f32 %v2093_v46, %v278_v13 }
  0x90   :  { %v181_v17 = vrot.slane %v180_v42, 1  ;;  %v188_v18 = vrot.slane %v187_v6, 1  ;;  %v70_v33 = vrot.slane %v69_v62, 4  ;;  %v233_v40 = vrot.slane %v232_v10, 4 }
  0x91   :  { %v444_v34 = vrot.slane %v443_v11, 4  ;;  %v281_v9 = vmax.f32 %v2117_v63, %v280_v21  ;;  %v196_v7 = vadd.f32 %v195_v4, %v2084_v36  ;;  %v212_v38 = vsel %vm211_vm9, %v2052_v5, %v210_v25  ;;  %v2170_v36 = vld [vmem:[%s3019_s0 + $0x10] sm:$0xff] }
  0x92   :  { %v182_v50 = vadd.f32 %v181_v17, %v180_v42  ;;  %v189_v59 = vadd.f32 %v188_v18, %v187_v6  ;;  %v71_v61 = vadd.f32 %v70_v33, %v69_v62  ;;  %v234_v55 = vadd.f32 %v233_v40, %v232_v10 }
  0x93   :  { %v2162_v6 = vadd.f32 %v444_v34, %v443_v11  ;;  %v2165_v46 = vsel %vm55_vm1, %v653_v39, 0.0  ;;  %v90_v4 = vadd.f32 %v89_v44, %v88_v14  ;;  %v284_v21 = vmax.f32 %v277_v19, %v279_v32 }
  0x94   :  { %v214_v8 = vsel %vm213_vm10, %v182_v50, %v212_v38  ;;  %v72_v2 = vrot.slane %v71_v61, 2  ;;  %v235_v42 = vrot.slane %v234_v55, 2  ;;  %v285_v29 = vmax.f32 %v281_v9, %v283_v27 }
  0x95   :  { %v216_v41 = vsel %vm215_vm11, %v189_v59, %v214_v8  ;;  %v351_v62 = vmul.f32 %v2010_v43, %v2049_v3  ;;  %v353_v10 = vmul.f32 %v2010_v43, %v2047_v1  ;;  %v655_v11 = vrot.slane %v2165_v46, 4 }
  0x96   :  { %v218_v5 = vsel %vm217_vm12, %v196_v7, %v216_v41  ;;  %v73_v63 = vadd.f32 %v72_v2, %v71_v61  ;;  %v2181_v13 = vmul.f32 %v2024_v51, %v2134_v0  ;;  %v2183_v17 = vadd.f32 %v61_v12, %v60_v58  ;;  %v2188_v2 = vld [vmem:[%s3021_s2 + $0x1] sm:$0x1] }
  0x97   :  { %v220_v28 = vmul.f32 %v2018_v47, %v218_v5  ;;  %v343_v14 = vmul.f32 %v2010_v43, %v2170_v36  ;;  %v236_v41 = vadd.f32 %v235_v42, %v234_v55  ;;  %v446_v47 = vrot.slane %v2162_v6, 2 }
  0x98   :  { %v2194_v19 = vmax.f32 %v284_v21, %v285_v29  ;;  %v74_v25 = vrot.slane %v73_v63, 1  ;;  %v91_v33 = vrot.slane %v90_v4, 1  ;;  %v2198_v12 = vmul.f32 %v2010_v43, %v2105_v54 }
  0x99   :  { %v221_v27 = vsel %vm55_vm1, %v220_v28, 0.0  ;;  %vm84_vm13 = vcmp.gt.f32.partialorder %v2188_v2, 0.5  ;;  %v344_v39 = vsel %vm55_vm1, %v343_v14, 0.0  ;;  %v237_v32 = vrot.slane %v236_v41, 1 }
  0x9a   :  { %v222_v18 = vrot.slane %v221_v27, 4  ;;  %v287_v58 = vsub.f32 %v2074_v26, %v2194_v19  ;;  %v288_v40 = vsub.f32 %v2063_v22, %v2194_v19  ;;  %v289_v34 = vsub.f32 %v2082_v35, %v2194_v19 }
  0x9b   :  { %v290_v50 = vsub.f32 %v2079_v31, %v2194_v19  ;;  %v291_v59 = vsub.f32 %v2066_v23, %v2194_v19  ;;  %v292_v61 = vsub.f32 %v2132_v49, %v2194_v19  ;;  %v293_v26 = vsub.f32 %v2129_v30, %v2194_v19 }
  0x9c   :  { %v223_v44 = vadd.f32 %v222_v18, %v221_v27  ;;  %v295_v22 = vmul.f32 1.442695, %v287_v58  ;;  %v2218_v35 = vmul.f32 %v2010_v43, %v2103_v53  ;;  %v297_v7 = vmul.f32 1.442695, %v288_v40 }
  0x9d   :  { %v299_v38 = vmul.f32 1.442695, %v289_v34  ;;  %v345_v55 = vrot.slane %v344_v39, 4  ;;  %v75_v31 = vadd.f32 %v74_v25, %v73_v63  ;;  %v301_v8 = vmul.f32 1.442695, %v290_v50 }
  0x9e   :  { %v224_v9 = vrot.slane %v223_v44, 2  ;;  %1696 = vpow2.f32 %v295_v22  ;;  %v303_v23 = vmul.f32 1.442695, %v291_v59  ;;  %v92_v42 = vadd.f32 %v91_v33, %v90_v4 }
  0x9f   :  { %1698 = vpow2.f32 %v297_v7  ;;  %v305_v49 = vmul.f32 1.442695, %v292_v61  ;;  %v307_v21 = vmul.f32 1.442695, %v293_v26  ;;  %v346_v30 = vadd.f32 %v345_v55, %v344_v39 }
  0xa0   :  { %v225_v5 = vadd.f32 %v224_v9, %v223_v44  ;;  %1700 = vpow2.f32 %v299_v38  ;;  %v359_v28 = vsel %vm55_vm1, %v351_v62, 0.0  ;;  %v294_v14 = vsub.f32 %v2108_v57, %v2194_v19 }
  0xa1   :  { %1702 = vpow2.f32 %v301_v8  ;;  %v360_v27 = vrot.slane %v359_v28, 4  ;;  %v238_v18 = vadd.f32 %v237_v32, %v236_v41  ;;  %v367_v63 = vrot.slane %v2089_v45, 4 }
  0xa2   :  { %v226_v29 = vrot.slane %v225_v5, 1  ;;  %1704 = vpow2.f32 %v303_v23  ;;  %v373_v4 = vsel %vm55_vm1, %v353_v10, 0.0  ;;  %v3040_v33 = vmov 0  }
  0xa3   :  { %1706 = vpow2.f32 %v305_v49  ;;  %v2228_v58 = vsel %vm84_vm13, 1, %v3040_v33  ;;  %v361_v62 = vadd.f32 %v360_v27, %v359_v28  ;;  %v347_v34 = vrot.slane %v346_v30, 2 }
  0xa4   :  { %v227_v25 = vadd.f32 %v226_v29, %v225_v5  ;;  %v1697_v40 = vpop.eup %1696  ;;  %1708 = vpow2.f32 %v307_v21  ;;  %v368_v57 = vadd.f32 %v367_v63, %v2089_v45  ;;  %v374_v39 = vrot.slane %v373_v4, 4 }
  0xa5   :  { %v1699_v41 = vpop.eup %1698  ;;  %v309_v50 = vmul.f32 1.442695, %v294_v14  ;;  %v311_v59 = vsel %vm55_vm1, %v1697_v40, 0.0  ;;  %v362_v10 = vrot.slane %v361_v62, 2  ;;  %v2234_v32 = vsel %vm84_vm13, %v238_v18, %v75_v31  ;;  %v2245_v31 = vld [vmem:[%s3021_s2 + $0x2] sm:$0x1] }
  0xa6   :  { %v228_v44 = vadd.f32 %v227_v25, %v92_v42  ;;  %v1701_v61 = vpop.eup %1700  ;;  %v312_v26 = vsel %vm55_vm1, %v1699_v41, 0.0  ;;  %v369_v22 = vrot.slane %v368_v57, 2  ;;  %v375_v9 = vadd.f32 %v374_v39, %v373_v4 }
  0xa7   :  { %v1703_v7 = vpop.eup %1702  ;;  %v313_v45 = vadd.f32 %v312_v26, %v311_v59  ;;  %v331_v55 = vperm.slane %v2228_v58, 0  ;;  %v363_v8 = vadd.f32 %v362_v10, %v361_v62  ;;  %v314_v42 = vsel %vm55_vm1, %v1701_v61, 0.0 }
  0xa8   :  { %v2238_v38 = vmul.f32 %v228_v44, %v2188_v2  ;;  %v1705_v23 = vpop.eup %1704  ;;  %v2247_v5 = vadd.f32 %v347_v34, %v346_v30  ;;  %v370_v49 = vadd.f32 %v369_v22, %v368_v57  ;;  %v376_v21 = vrot.slane %v375_v9, 2 }
  0xa9   :  { %v1707_v28 = vpop.eup %1706  ;;  %1710 = vpow2.f32 %v309_v50  ;;  %v315_v2 = vadd.f32 %v314_v42, %v313_v45  ;;  %v316_v29 = vsel %vm55_vm1, %v1703_v7, 0.0  ;;  %v364_v14 = vrot.slane %v363_v8, 1 }
  0xaa   :  { %v1709_v27 = vpop.eup %1708  ;;  %v318_v18 = vsel %vm55_vm1, %v1705_v23, 0.0  ;;  %v371_v63 = vrot.slane %v370_v49, 1  ;;  %v377_v4 = vadd.f32 %v376_v21, %v375_v9  ;;  %v380_v25 = vsel %vm55_vm1, %v2028_v52, 0.0 }
  0xab   :  { %v317_v62 = vadd.f32 %v316_v29, %v315_v2  ;;  %v320_v30 = vsel %vm55_vm1, %v1707_v28, 0.0  ;;  %v322_v40 = vsel %vm55_vm1, %v1709_v27, 0.0  ;;  %vm342_vm14 = vcmp.gt.f32.partialorder %v2245_v31, 0.5 }
  0xac   :  { %v381_v34 = vrot.slane %v380_v25, 4  ;;  %v365_v57 = vadd.f32 %v364_v14, %v363_v8  ;;  %v372_v39 = vadd.f32 %v371_v63, %v370_v49  ;;  %v378_v41 = vrot.slane %v377_v4, 1 }
  0xad   :  { %v387_v44 = vsel %vm55_vm1, %v2036_v56, 0.0  ;;  %v319_v50 = vadd.f32 %v318_v18, %v317_v62  ;;  %v394_v52 = vsel %vm55_vm1, %v2198_v12, 0.0  ;;  %v401_v22 = vsel %vm55_vm1, %v2218_v35, 0.0 }
  0xae   :  { %v382_v59 = vadd.f32 %v381_v34, %v380_v25  ;;  %v388_v10 = vrot.slane %v387_v44, 4  ;;  %v379_v61 = vadd.f32 %v378_v41, %v377_v4  ;;  %v395_v26 = vrot.slane %v394_v52, 4 }
  0xaf   :  { %v408_v9 = vsel %vm55_vm1, %v2044_v60, 0.0  ;;  %v1711_v7 = vpop.eup %1710  ;;  %v321_v45 = vadd.f32 %v320_v30, %v319_v50  ;;  %v402_v42 = vrot.slane %v401_v22, 4  ;;  %v423_v21 = vsel %vm205_vm6, %v372_v39, %v365_v57 }
  0xb0   :  { %v383_v8 = vrot.slane %v382_v59, 2  ;;  %v389_v23 = vadd.f32 %v388_v10, %v387_v44  ;;  %v396_v56 = vadd.f32 %v395_v26, %v394_v52  ;;  %v409_v49 = vrot.slane %v408_v9, 4 }
  0xb1   :  { %v447_v12 = vadd.f32 %v446_v47, %v2162_v6  ;;  %v323_v28 = vadd.f32 %v322_v40, %v321_v45  ;;  %v403_v35 = vadd.f32 %v402_v42, %v401_v22  ;;  %v324_v14 = vsel %vm55_vm1, %v1711_v7, 0.0  ;;  %v2273_v6 = vld [vmem:[%s3019_s0 + $0x18] sm:$0xff] }
  0xb2   :  { %v384_v2 = vadd.f32 %v383_v8, %v382_v59  ;;  %v390_v29 = vrot.slane %v389_v23, 2  ;;  %v397_v60 = vrot.slane %v396_v56, 2  ;;  %v410_v27 = vadd.f32 %v409_v49, %v408_v9 }
  0xb3   :  { %v448_v18 = vrot.slane %v447_v12, 1  ;;  %v325_v63 = vadd.f32 %v324_v14, %v323_v28  ;;  %v404_v62 = vrot.slane %v403_v35, 2  ;;  %v424_v57 = vsel %vm207_vm7, %v379_v61, %v423_v21 }
  0xb4   :  { %v385_v4 = vrot.slane %v384_v2, 1  ;;  %v391_v25 = vadd.f32 %v390_v29, %v389_v23  ;;  %v398_v30 = vadd.f32 %v397_v60, %v396_v56  ;;  %v411_v34 = vrot.slane %v410_v27, 2 }
  0xb5   :  { %v449_v39 = vadd.f32 %v448_v18, %v447_v12  ;;  %1712 = vlog2.f32 %v325_v63  ;;  %v405_v41 = vadd.f32 %v404_v62, %v403_v35  ;;  %v554_v10 = vmul.f32 %v2021_v48, %v2273_v6 }
  0xb6   :  { %v386_v47 = vadd.f32 %v385_v4, %v384_v2  ;;  %v392_v40 = vrot.slane %v391_v25, 1  ;;  %v399_v44 = vrot.slane %v398_v30, 1  ;;  %v412_v50 = vadd.f32 %v411_v34, %v410_v27 }
  0xb7   :  { %v2278_v59 = vsel %vm342_vm14, %v449_v39, %v2234_v32  ;;  %v349_v52 = vrot.slane %v2247_v5, 1  ;;  %v406_v26 = vrot.slane %v405_v41, 1  ;;  %v2286_v9 = vsel %vm55_vm1, %v2181_v13, 0.0 }
  0xb8   :  { %v393_v61 = vadd.f32 %v392_v40, %v391_v25  ;;  %v425_v22 = vsel %vm209_vm8, %v386_v47, %v424_v57  ;;  %v400_v7 = vadd.f32 %v399_v44, %v398_v30  ;;  %v413_v45 = vrot.slane %v412_v50, 1 }
  0xb9   :  { %v562_v8 = vmul.f32 %v2021_v48, %v2049_v3  ;;  %v407_v32 = vadd.f32 %v406_v26, %v405_v41  ;;  %v555_v42 = vsel %vm55_vm1, %v554_v10, 0.0  ;;  %v563_v56 = vmul.f32 %v2021_v48, %v2003_v37 }
  0xba   :  { %v426_v23 = vsel %vm211_vm9, %v393_v61, %v425_v22  ;;  %v414_v49 = vadd.f32 %v413_v45, %v412_v50  ;;  %v564_v13 = vmul.f32 %v2021_v48, %v2047_v1  ;;  %v565_v12 = vmul.f32 %v2021_v48, %v1972_v16 }
  0xbb   :  { %v427_v21 = vsel %vm213_vm10, %v400_v7, %v426_v23  ;;  %v1713_v28 = vpop.eup %1712  ;;  %v2301_v2 = vadd.f32 %v2238_v38, %v2183_v17  ;;  %vm2305_vm15 = vcmp.eq.s32.totalorder %v331_v55, 1  ;;  %v2310_v35 = vadd.f32 %v349_v52, %v2247_v5  ;;  %v3043_v52 = vld [vmem:[#allocation10_spill] sm:$0xff] }
  0xbc   :  { %v428_v14 = vsel %vm215_vm11, %v407_v32, %v427_v21  ;;  %v327_v60 = vmul.f32 0.6931472, %v1713_v28  ;;  %v556_v18 = vrot.slane %v555_v42, 4  ;;  %v570_v63 = vsel %vm55_vm1, %v562_v8, 0.0 }
  0xbd   :  { %v429_v27 = vsel %vm217_vm12, %v414_v49, %v428_v14  ;;  %v566_v58 = vmul.f32 %v2021_v48, %v1977_v20  ;;  %v571_v38 = vrot.slane %v570_v63, 4  ;;  %v577_v55 = vsel %vm55_vm1, %v563_v56, 0.0 }
  0xbe   :  { %v431_v17 = vmul.f32 %v1970_v15, %v429_v27  ;;  %v328_v4 = vadd.f32 %v327_v60, %v2194_v19  ;;  %v578_v5 = vrot.slane %v577_v55, 4  ;;  %v584_v25 = vsel %vm55_vm1, %v564_v13, 0.0 }
  0xbf   :  { %v591_v62 = vsel %vm55_vm1, %v565_v12, 0.0  ;;  %v2325_v34 = vmul.f32 %v2021_v48, %v2105_v54  ;;  %v572_v15 = vadd.f32 %v571_v38, %v570_v63  ;;  %v585_v57 = vrot.slane %v584_v25, 4 }
  0xc0   :  { %v432_v30 = vsel %vm55_vm1, %v431_v17, 0.0  ;;  %v329_v39 = vadd.f32 %v2071_v24, %v328_v4  ;;  %v579_v40 = vadd.f32 %v578_v5, %v577_v55  ;;  %v592_v41 = vrot.slane %v591_v62, 4 }
  0xc1   :  { %v433_v47 = vrot.slane %v432_v30, 4  ;;  %v2328_v44 = vadd.f32 %v556_v18, %v555_v42  ;;  %v573_v19 = vrot.slane %v572_v15, 2  ;;  %v586_v50 = vadd.f32 %v585_v57, %v584_v25 }
  0xc2   :  { %v2331_v10 = vsel %vm55_vm1, %v566_v58, 0.0  ;;  %v2336_v61 = vsel %vm2305_vm15, %v329_v39, %v3043_v52  ;;  %v580_v22 = vrot.slane %v579_v40, 2  ;;  %v2338_v7 = vadd.f32 %v592_v41, %v591_v62  ;;  %v3044_v62 = vld [vmem:[#allocation9_spill] sm:$0xff] }
  0xc3   :  { %v434_v26 = vadd.f32 %v433_v47, %v432_v30  ;;  %v452_v24 = vrot.slane %v2336_v61, 1  ;;  %v453_v45 = vrot.slane %v2336_v61, 2  ;;  %v454_v8 = vrot.slane %v2336_v61, 3 }
  0xc4   :  { %v455_v32 = vrot.slane %v2336_v61, 4  ;;  %v456_v42 = vrot.slane %v2336_v61, 5  ;;  %v457_v56 = vrot.slane %v2336_v61, 6  ;;  %v458_v49 = vrot.slane %v2336_v61, 7 }
  0xc5   :  { %v435_v23 = vrot.slane %v434_v26, 2  ;;  %v459_v21 = vperm.slane %v2336_v61, 0  ;;  %v460_v13 = vperm.slane %v452_v24, 0  ;;  %v461_v12 = vperm.slane %v453_v45, 0 }
  0xc6   :  { %v462_v28 = vperm.slane %v454_v8, 0  ;;  %v463_v14 = vperm.slane %v455_v32, 0  ;;  %v464_v60 = vperm.slane %v456_v42, 0  ;;  %v465_v27 = vperm.slane %v457_v56, 0 }
  0xc7   :  { %v436_v29 = vadd.f32 %v435_v23, %v434_v26  ;;  %v466_v18 = vperm.slane %v458_v49, 0  ;;  %v475_v63 = vadd.f32 %v459_v21, %v2049_v3  ;;  %v476_v17 = vadd.f32 %v460_v13, %v2003_v37 }
  0xc8   :  { %v477_v58 = vadd.f32 %v461_v12, %v2047_v1  ;;  %v478_v55 = vadd.f32 %v462_v28, %v1972_v16  ;;  %v479_v4 = vadd.f32 %v463_v14, %v1977_v20  ;;  %v480_v5 = vadd.f32 %v464_v60, %v2105_v54 }
  0xc9   :  { %v437_v38 = vrot.slane %v436_v29, 1  ;;  %v2355_v25 = vadd.f32 %v465_v27, %v2103_v53  ;;  %v2358_v30 = vadd.f32 %v466_v18, %v3044_v62  ;;  %v483_v57 = vsel %vm55_vm1, %v475_v63, -inf }
  0xca   :  { %v484_v39 = vsel %vm55_vm1, %v476_v17, -inf  ;;  %v485_v41 = vsel %vm55_vm1, %v477_v58, -inf  ;;  %v486_v52 = vsel %vm55_vm1, %v478_v55, -inf  ;;  %v487_v26 = vsel %vm55_vm1, %v479_v4, -inf }
  0xcb   :  { %v438_v47 = vadd.f32 %v437_v38, %v436_v29  ;;  %v488_v24 = vmax.f32 %v483_v57, %v487_v26  ;;  %v489_v45 = vsel %vm55_vm1, %v480_v5, -inf  ;;  %v491_v8 = vsel %vm55_vm1, %v2355_v25, -inf }
  0xcc   :  { %v493_v32 = vsel %vm55_vm1, %v2358_v30, -inf  ;;  %v490_v42 = vmax.f32 %v484_v39, %v489_v45  ;;  %v492_v56 = vmax.f32 %v485_v41, %v491_v8  ;;  %v558_v21 = vrot.slane %v2328_v44, 2 }
  0xcd   :  { %v439_v23 = vadd.f32 %v438_v47, %v2310_v35  ;;  %v494_v49 = vmax.f32 %v486_v52, %v493_v32  ;;  %v574_v13 = vadd.f32 %v573_v19, %v572_v15  ;;  %v581_v12 = vadd.f32 %v580_v22, %v579_v40 }
  0xce   :  { %v587_v28 = vrot.slane %v586_v50, 2  ;;  %v2375_v29 = vadd.f32 %v655_v11, %v2165_v46  ;;  %v495_v60 = vmax.f32 %v488_v24, %v490_v42  ;;  %v866_v18 = vrot.slane %v2286_v9, 4 }
  0xcf   :  { %v440_v14 = vmul.f32 %v439_v23, %v2245_v31  ;;  %v496_v27 = vmax.f32 %v492_v56, %v494_v49  ;;  %v568_v35 = vmul.f32 %v2021_v48, %v2103_v53  ;;  %v599_v57 = vrot.slane %v2331_v10, 4 }
  0xd0   :  { %v588_v38 = vadd.f32 %v587_v28, %v586_v50  ;;  %v569_v46 = vmul.f32 %v2021_v48, %v3044_v62  ;;  %v594_v11 = vrot.slane %v2338_v7, 2  ;;  %v2391_v19 = vadd.f32 %v558_v21, %v2328_v44 }
  0xd1   :  { %v2383_v15 = vadd.f32 %v440_v14, %v2301_v2  ;;  %v2385_v40 = vmax.f32 %v495_v60, %v496_v27  ;;  %v575_v22 = vrot.slane %v574_v13, 1  ;;  %v582_v39 = vrot.slane %v581_v12, 1 }
  0xd2   :  { %v605_v50 = vsel %vm55_vm1, %v2325_v34, 0.0  ;;  %v589_v45 = vrot.slane %v588_v38, 1  ;;  %v600_v44 = vadd.f32 %v599_v57, %v2331_v10  ;;  %v595_v34 = vadd.f32 %v594_v11, %v2338_v7 }
  0xd3   :  { %v498_v47 = vsub.f32 %v475_v63, %v2385_v40  ;;  %v499_v2 = vsub.f32 %v476_v17, %v2385_v40  ;;  %v500_v41 = vsub.f32 %v477_v58, %v2385_v40  ;;  %v501_v52 = vsub.f32 %v478_v55, %v2385_v40 }
  0xd4   :  { %v502_v26 = vsub.f32 %v479_v4, %v2385_v40  ;;  %v503_v24 = vsub.f32 %v480_v5, %v2385_v40  ;;  %v504_v63 = vsub.f32 %v2355_v25, %v2385_v40  ;;  %v576_v42 = vadd.f32 %v575_v22, %v574_v13 }
  0xd5   :  { %v506_v8 = vmul.f32 1.442695, %v498_v47  ;;  %v508_v32 = vmul.f32 1.442695, %v499_v2  ;;  %v510_v23 = vmul.f32 1.442695, %v500_v41  ;;  %v583_v58 = vadd.f32 %v582_v39, %v581_v12 }
  0xd6   :  { %v512_v17 = vmul.f32 1.442695, %v501_v52  ;;  %v505_v55 = vsub.f32 %v2358_v30, %v2385_v40  ;;  %v514_v4 = vmul.f32 1.442695, %v502_v26  ;;  %v516_v5 = vmul.f32 1.442695, %v503_v24 }
  0xd7   :  { %1714 = vpow2.f32 %v506_v8  ;;  %v601_v56 = vrot.slane %v600_v44, 2  ;;  %v606_v10 = vrot.slane %v605_v50, 4  ;;  %v612_v49 = vsel %vm55_vm1, %v568_v35, 0.0  ;;  %v2411_v30 = vld [vmem:[%s3021_s2 + $0x3] sm:$0x1] }
  0xd8   :  { %1716 = vpow2.f32 %v508_v32  ;;  %v590_v21 = vadd.f32 %v589_v45, %v588_v38  ;;  %v596_v7 = vrot.slane %v595_v34, 1  ;;  %v613_v28 = vrot.slane %v612_v49, 4 }
  0xd9   :  { %1718 = vpow2.f32 %v510_v23  ;;  %v518_v25 = vmul.f32 1.442695, %v504_v63  ;;  %v602_v14 = vadd.f32 %v601_v56, %v600_v44  ;;  %v607_v13 = vadd.f32 %v606_v10, %v605_v50 }
  0xda   :  { %1720 = vpow2.f32 %v512_v17  ;;  %v614_v12 = vadd.f32 %v613_v28, %v612_v49  ;;  %v619_v60 = vsel %vm55_vm1, %v569_v46, 0.0  ;;  %v634_v27 = vsel %vm205_vm6, %v583_v58, %v576_v42 }
  0xdb   :  { %1722 = vpow2.f32 %v514_v4  ;;  %v520_v35 = vmul.f32 1.442695, %v505_v55  ;;  %v603_v38 = vrot.slane %v602_v14, 1  ;;  %v608_v57 = vrot.slane %v607_v13, 2 }
  0xdc   :  { %1724 = vpow2.f32 %v516_v5  ;;  %v597_v22 = vadd.f32 %v596_v7, %v595_v34  ;;  %v615_v39 = vrot.slane %v614_v12, 2  ;;  %v620_v47 = vrot.slane %v619_v60, 4  ;;  %v1673_v5 = vld [vmem:[%s3019_s0 + $0x20] sm:$0xff] }
  0xdd   :  { %v1715_v11 = vpop.eup %1714  ;;  %v635_v50 = vsel %vm207_vm7, %v590_v21, %v634_v27  ;;  %1726 = vpow2.f32 %v518_v25  ;;  %vm553_vm0 = vcmp.gt.f32.partialorder %v2411_v30, 0.5  ;;  %v609_v52 = vadd.f32 %v608_v57, %v607_v13 }
  0xde   :  { %v1717_v2 = vpop.eup %1716  ;;  %v522_v41 = vsel %vm55_vm1, %v1715_v11, 0.0  ;;  %v773_v46 = vmul.f32 %v2024_v51, %v2049_v3  ;;  %v616_v45 = vadd.f32 %v615_v39, %v614_v12  ;;  %v621_v44 = vadd.f32 %v620_v47, %v619_v60 }
  0xdf   :  { %v1719_v26 = vpop.eup %1718  ;;  %v523_v24 = vsel %vm55_vm1, %v1717_v2, 0.0  ;;  %v636_v8 = vsel %vm209_vm8, %v597_v22, %v635_v50  ;;  %1728 = vpow2.f32 %v520_v35  ;;  %v604_v34 = vadd.f32 %v603_v38, %v602_v14 }
  0xe0   :  { %v1721_v32 = vpop.eup %1720  ;;  %v524_v23 = vadd.f32 %v523_v24, %v522_v41  ;;  %v610_v63 = vrot.slane %v609_v52, 1  ;;  %v525_v42 = vsel %vm55_vm1, %v1719_v26, 0.0  ;;  %v617_v58 = vrot.slane %v616_v45, 1 }
  0xe1   :  { %v1723_v17 = vpop.eup %1722  ;;  %v622_v55 = vrot.slane %v621_v44, 2  ;;  %v657_v4 = vrot.slane %v2375_v29, 2  ;;  %v637_v21 = vsel %vm211_vm9, %v604_v34, %v636_v8  ;;  %v765_v7 = vmul.f32 %v2024_v51, %v1673_v5 }
  0xe2   :  { %v1725_v56 = vpop.eup %1724  ;;  %v526_v10 = vadd.f32 %v525_v42, %v524_v23  ;;  %v611_v49 = vadd.f32 %v610_v63, %v609_v52  ;;  %v527_v28 = vsel %vm55_vm1, %v1721_v32, 0.0  ;;  %v618_v25 = vadd.f32 %v617_v58, %v616_v45 }
  0xe3   :  { %v623_v14 = vadd.f32 %v622_v55, %v621_v44  ;;  %v658_v13 = vadd.f32 %v657_v4, %v2375_v29  ;;  %v1727_v12 = vpop.eup %1726  ;;  %v2434_v27 = vsel %vm342_vm14, 1, %v3040_v33  ;;  %v766_v38 = vsel %vm55_vm1, %v765_v7, 0.0 }
  0xe4   :  { %v528_v60 = vadd.f32 %v527_v28, %v526_v10  ;;  %v638_v35 = vsel %vm213_vm10, %v611_v49, %v637_v21  ;;  %v529_v57 = vsel %vm55_vm1, %v1723_v17, 0.0  ;;  %v531_v11 = vsel %vm55_vm1, %v1725_v56, 0.0 }
  0xe5   :  { %v624_v22 = vrot.slane %v623_v14, 1  ;;  %v659_v39 = vrot.slane %v658_v13, 1  ;;  %v1729_v47 = vpop.eup %1728  ;;  %v639_v29 = vsel %vm215_vm11, %v618_v25, %v638_v35  ;;  %v767_v2 = vrot.slane %v766_v38, 4 }
  0xe6   :  { %v530_v50 = vadd.f32 %v529_v57, %v528_v60  ;;  %v774_v31 = vmul.f32 %v2024_v51, %v2003_v37  ;;  %v775_v26 = vmul.f32 %v2024_v51, %v2047_v1  ;;  %v776_v24 = vmul.f32 %v2024_v51, %v1972_v16 }
  0xe7   :  { %v625_v41 = vadd.f32 %v624_v22, %v623_v14  ;;  %v660_v52 = vadd.f32 %v659_v39, %v658_v13  ;;  %v533_v44 = vsel %vm55_vm1, %v1727_v12, 0.0  ;;  %v542_v8 = vperm.slane %v2434_v27, 0 }
  0xe8   :  { %v532_v45 = vadd.f32 %v531_v11, %v530_v50  ;;  %v560_v32 = vrot.slane %v2391_v19, 1  ;;  %v535_v23 = vsel %vm55_vm1, %v1729_v47, 0.0  ;;  %v777_v17 = vmul.f32 %v2024_v51, %v1977_v20 }
  0xe9   :  { %v640_v34 = vsel %vm217_vm12, %v625_v41, %v639_v29  ;;  %v2455_v63 = vsel %vm553_vm0, %v660_v52, %v2278_v59  ;;  %v2460_v55 = vadd.f32 %v767_v2, %v766_v38  ;;  %v781_v4 = vsel %vm55_vm1, %v773_v46, 0.0 }
  0xea   :  { %v534_v42 = vadd.f32 %v533_v44, %v532_v45  ;;  %v642_v58 = vmul.f32 %v2010_v43, %v640_v34  ;;  %v782_v5 = vrot.slane %v781_v4, 4  ;;  %v788_v56 = vsel %vm55_vm1, %v774_v31, 0.0 }
  0xeb   :  { %v795_v10 = vsel %vm55_vm1, %v775_v26, 0.0  ;;  %v802_v49 = vsel %vm55_vm1, %v776_v24, 0.0  ;;  %v778_v7 = vmul.f32 %v2024_v51, %v2105_v54  ;;  %v789_v28 = vrot.slane %v788_v56, 4 }
  0xec   :  { %v536_v21 = vadd.f32 %v535_v23, %v534_v42  ;;  %v643_v59 = vsel %vm55_vm1, %v642_v58, 0.0  ;;  %v783_v43 = vadd.f32 %v782_v5, %v781_v4  ;;  %v796_v14 = vrot.slane %v795_v10, 4 }
  0xed   :  { %v644_v25 = vrot.slane %v643_v59, 4  ;;  %v803_v13 = vrot.slane %v802_v49, 4  ;;  %v779_v46 = vmul.f32 %v2024_v51, %v2103_v53  ;;  %v790_v12 = vadd.f32 %v789_v28, %v788_v56 }
  0xee   :  { %1730 = vlog2.f32 %v536_v21  ;;  %v809_v60 = vsel %vm55_vm1, %v777_v17, 0.0  ;;  %v784_v35 = vrot.slane %v783_v43, 2  ;;  %v797_v38 = vadd.f32 %v796_v14, %v795_v10 }
  0xef   :  { %v645_v27 = vadd.f32 %v644_v25, %v643_v59  ;;  %v804_v57 = vadd.f32 %v803_v13, %v802_v49  ;;  %v780_v11 = vmul.f32 %v2024_v51, %v3044_v62  ;;  %v791_v22 = vrot.slane %v790_v12, 2 }
  0xf0   :  { %v810_v39 = vrot.slane %v809_v60, 4  ;;  %v816_v47 = vsel %vm55_vm1, %v778_v7, 0.0  ;;  %v785_v29 = vadd.f32 %v784_v35, %v783_v43  ;;  %v798_v2 = vrot.slane %v797_v38, 2 }
  0xf1   :  { %v646_v50 = vrot.slane %v645_v27, 2  ;;  %v805_v31 = vrot.slane %v804_v57, 2  ;;  %v792_v41 = vadd.f32 %v791_v22, %v790_v12  ;;  %v817_v26 = vrot.slane %v816_v47, 4 }
  0xf2   :  { %v811_v52 = vadd.f32 %v810_v39, %v809_v60  ;;  %v823_v24 = vsel %vm55_vm1, %v779_v46, 0.0  ;;  %v786_v44 = vrot.slane %v785_v29, 1  ;;  %v799_v23 = vadd.f32 %v798_v2, %v797_v38 }
  0xf3   :  { %v647_v45 = vadd.f32 %v646_v50, %v645_v27  ;;  %v806_v34 = vadd.f32 %v805_v31, %v804_v57  ;;  %v793_v42 = vrot.slane %v792_v41, 1  ;;  %v818_v4 = vadd.f32 %v817_v26, %v816_v47  ;;  %v3047_v26 = vld [vmem:[#allocation8_spill] sm:$0xff] }
  0xf4   :  { %v1731_v17 = vpop.eup %1730  ;;  %v812_v58 = vrot.slane %v811_v52, 2  ;;  %v824_v5 = vrot.slane %v823_v24, 4  ;;  %vm2476_vm2 = vcmp.eq.s32.totalorder %v542_v8, 1  ;;  %v561_v49 = vadd.f32 %v560_v32, %v2391_v19  ;;  %v2489_v19 = vld [vmem:[%s3020_s1 + $0x5] ss:$0 sm:$0xff] }
  0xf5   :  { %v538_v56 = vmul.f32 0.6931472, %v1731_v17  ;;  %v648_v21 = vrot.slane %v647_v45, 1  ;;  %v800_v59 = vrot.slane %v799_v23, 1  ;;  %v807_v7 = vrot.slane %v806_v34, 1 }
  0xf6   :  { %v2481_v28 = vadd.f32 %v812_v58, %v811_v52  ;;  %v819_v25 = vrot.slane %v818_v4, 2  ;;  %v769_v13 = vrot.slane %v2460_v55, 2  ;;  %v825_v46 = vadd.f32 %v824_v5, %v823_v24 }
  0xf7   :  { %v539_v43 = vadd.f32 %v538_v56, %v2385_v40  ;;  %v649_v14 = vadd.f32 %v648_v21, %v647_v45  ;;  %v787_v12 = vadd.f32 %v786_v44, %v785_v29  ;;  %v794_v60 = vadd.f32 %v793_v42, %v792_v41 }
  0xf8   :  { %v820_v8 = vadd.f32 %v819_v25, %v818_v4  ;;  %v830_v27 = vsel %vm55_vm1, %v780_v11, 0.0  ;;  %v826_v38 = vrot.slane %v825_v46, 2  ;;  %v801_v40 = vadd.f32 %v800_v59, %v799_v23 }
  0xf9   :  { %v540_v32 = vadd.f32 %v2170_v36, %v539_v43  ;;  %v650_v35 = vadd.f32 %v649_v14, %v561_v49  ;;  %v831_v57 = vrot.slane %v830_v27, 4  ;;  %v808_v22 = vadd.f32 %v807_v7, %v806_v34 }
  0xfa   :  { %v814_v39 = vrot.slane %v2481_v28, 1  ;;  %v821_v47 = vrot.slane %v820_v8, 1  ;;  %v827_v29 = vadd.f32 %v826_v38, %v825_v46  ;;  %vm972_vm3 = vcmp.eq.s32.totalorder %v3047_v26, %v2489_v19 }
  0xfb   :  { %v2496_v50 = vsel %vm2476_vm2, %v540_v32, %v2336_v61  ;;  %v651_v11 = vmul.f32 %v650_v35, %v2411_v30  ;;  %v832_v2 = vadd.f32 %v831_v57, %v830_v27 }
  0xfc   :  { %v663_v31 = vrot.slane %v2496_v50, 1  ;;  %v664_v36 = vrot.slane %v2496_v50, 2  ;;  %v665_v41 = vrot.slane %v2496_v50, 3  ;;  %v666_v52 = vrot.slane %v2496_v50, 4 }
  0xfd   :  { %v2506_v24 = vadd.f32 %v651_v11, %v2383_v15  ;;  %v667_v61 = vrot.slane %v2496_v50, 5  ;;  %v668_v45 = vrot.slane %v2496_v50, 6  ;;  %v669_v44 = vrot.slane %v2496_v50, 7 }
  0xfe   :  { %v670_v23 = vperm.slane %v2496_v50, 0  ;;  %v671_v34 = vperm.slane %v663_v31, 0  ;;  %v672_v17 = vperm.slane %v664_v36, 0  ;;  %v673_v42 = vperm.slane %v665_v41, 0 }
  0xff   :  { %v674_v58 = vperm.slane %v666_v52, 0  ;;  %v675_v4 = vperm.slane %v667_v61, 0  ;;  %v676_v5 = vperm.slane %v668_v45, 0  ;;  %v677_v56 = vperm.slane %v669_v44, 0 }
 0x100   :  { %v686_v10 = vadd.f32 %v670_v23, %v2049_v3  ;;  %v687_v15 = vadd.f32 %v671_v34, %v2003_v37  ;;  %v688_v49 = vadd.f32 %v672_v17, %v2047_v1  ;;  %v689_v21 = vadd.f32 %v673_v42, %v1972_v16 }
 0x101   :  { %v690_v59 = vadd.f32 %v674_v58, %v1977_v20  ;;  %v691_v7 = vadd.f32 %v675_v4, %v2105_v54  ;;  %v692_v25 = vadd.f32 %v676_v5, %v2103_v53  ;;  %v2520_v43 = vadd.f32 %v677_v56, %v3044_v62  ;;  %v1675_v4 = vld [vmem:[%s3019_s0 + $0x28] sm:$0xff]  ;;  %v2540_v5 = vld [vmem:[%s3021_s2 + $0x4] sm:$0x1] }
 0x102   :  { %v694_v14 = vsel %vm55_vm1, %v686_v10, -inf  ;;  %v695_v46 = vsel %vm55_vm1, %v687_v15, -inf  ;;  %v696_v27 = vsel %vm55_vm1, %v688_v49, -inf  ;;  %v697_v32 = vsel %vm55_vm1, %v689_v21, -inf }
 0x103   :  { %v698_v35 = vsel %vm55_vm1, %v690_v59, -inf  ;;  %v700_v38 = vsel %vm55_vm1, %v691_v7, -inf  ;;  %v702_v57 = vsel %vm55_vm1, %v692_v25, -inf  ;;  %v704_v11 = vsel %vm55_vm1, %v2520_v43, -inf }
 0x104   :  { %v699_v31 = vmax.f32 %v694_v14, %v698_v35  ;;  %v701_v36 = vmax.f32 %v695_v46, %v700_v38  ;;  %v703_v41 = vmax.f32 %v696_v27, %v702_v57  ;;  %v705_v52 = vmax.f32 %v697_v32, %v704_v11 }
 0x105   :  { %v822_v61 = vadd.f32 %v821_v47, %v820_v8  ;;  %v828_v45 = vrot.slane %v827_v29, 1  ;;  %v833_v44 = vrot.slane %v832_v2, 2  ;;  %v845_v23 = vsel %vm205_vm6, %v794_v60, %v787_v12 }
 0x106   :  { %v706_v34 = vmax.f32 %v699_v31, %v701_v36  ;;  %v707_v17 = vmax.f32 %v703_v41, %v705_v52  ;;  %v815_v42 = vadd.f32 %v814_v39, %v2481_v28  ;;  %v846_v58 = vsel %vm207_vm7, %v801_v40, %v845_v23 }
 0x107   :  { %v834_v8 = vadd.f32 %v833_v44, %v832_v2  ;;  %v847_v47 = vsel %vm209_vm8, %v808_v22, %v846_v58  ;;  %v867_v12 = vadd.f32 %v866_v18, %v2286_v9  ;;  %v3048_v60 = vmov 0.0  }
 0x108   :  { %v2550_v28 = vsel %vm972_vm3, 1.0, %v3048_v60  ;;  %v2552_v40 = vmax.f32 %v706_v34, %v707_v17  ;;  %v770_v39 = vadd.f32 %v769_v13, %v2460_v55  ;;  %v848_v2 = vsel %vm211_vm9, %v815_v42, %v847_v47 }
 0x109   :  { %v829_v56 = vadd.f32 %v828_v45, %v827_v29  ;;  %v835_v22 = vrot.slane %v834_v8, 1  ;;  %v849_v14 = vsel %vm213_vm10, %v822_v61, %v848_v2  ;;  %v976_v9 = vmul.f32 %v2550_v28, %v1675_v4 }
 0x10a   :  { %v709_v18 = vsub.f32 %v686_v10, %v2552_v40  ;;  %v710_v19 = vsub.f32 %v687_v15, %v2552_v40  ;;  %v711_v46 = vsub.f32 %v688_v49, %v2552_v40  ;;  %v712_v27 = vsub.f32 %v689_v21, %v2552_v40 }
 0x10b   :  { %vm764_vm4 = vcmp.gt.f32.partialorder %v2540_v5, 0.5  ;;  %v713_v55 = vsub.f32 %v690_v59, %v2552_v40  ;;  %v714_v13 = vsub.f32 %v691_v7, %v2552_v40  ;;  %v715_v29 = vsub.f32 %v692_v25, %v2552_v40 }
 0x10c   :  { %v868_v32 = vrot.slane %v867_v12, 2  ;;  %v717_v35 = vmul.f32 1.442695, %v709_v18  ;;  %v719_v38 = vmul.f32 1.442695, %v710_v19  ;;  %v836_v11 = vadd.f32 %v835_v22, %v834_v8 }
 0x10d   :  { %v721_v57 = vmul.f32 1.442695, %v711_v46  ;;  %v716_v10 = vsub.f32 %v2520_v43, %v2552_v40  ;;  %v723_v15 = vmul.f32 1.442695, %v712_v27  ;;  %v850_v49 = vsel %vm215_vm11, %v829_v56, %v849_v14 }
 0x10e   :  { %v977_v21 = vsel %vm55_vm1, %v976_v9, 0.0  ;;  %1732 = vpow2.f32 %v717_v35  ;;  %v725_v31 = vmul.f32 1.442695, %v713_v55  ;;  %v771_v59 = vrot.slane %v770_v39, 1 }
 0x10f   :  { %v851_v7 = vsel %vm217_vm12, %v836_v11, %v850_v49  ;;  %1734 = vpow2.f32 %v719_v38  ;;  %v727_v25 = vmul.f32 1.442695, %v714_v13  ;;  %v869_v41 = vadd.f32 %v868_v32, %v867_v12 }
 0x110   :  { %v853_v36 = vmul.f32 %v2021_v48, %v851_v7  ;;  %1736 = vpow2.f32 %v721_v57  ;;  %v729_v52 = vmul.f32 1.442695, %v715_v29  ;;  %v978_v61 = vrot.slane %v977_v21, 4 }
 0x111   :  { %v984_v43 = vmul.f32 %v2550_v28, %v2049_v3  ;;  %1738 = vpow2.f32 %v723_v15  ;;  %v731_v45 = vmul.f32 1.442695, %v716_v10  ;;  %v870_v23 = vrot.slane %v869_v41, 1 }
 0x112   :  { %v854_v44 = vsel %vm55_vm1, %v853_v36, 0.0  ;;  %1740 = vpow2.f32 %v725_v31  ;;  %v772_v34 = vadd.f32 %v771_v59, %v770_v39  ;;  %v985_v42 = vmul.f32 %v2550_v28, %v2003_v37 }
 0x113   :  { %v855_v17 = vrot.slane %v854_v44, 4  ;;  %1742 = vpow2.f32 %v727_v25  ;;  %v871_v48 = vadd.f32 %v870_v23, %v869_v41  ;;  %v986_v58 = vmul.f32 %v2550_v28, %v2047_v1 }
 0x114   :  { %v987_v4 = vmul.f32 %v2550_v28, %v1972_v16  ;;  %v1733_v8 = vpop.eup %1732  ;;  %1744 = vpow2.f32 %v729_v52  ;;  %v2583_v12 = vadd.f32 %v978_v61, %v977_v21  ;;  %v988_v39 = vmul.f32 %v2550_v28, %v1977_v20 }
 0x115   :  { %v856_v47 = vadd.f32 %v855_v17, %v854_v44  ;;  %v1735_v2 = vpop.eup %1734  ;;  %1746 = vpow2.f32 %v731_v45  ;;  %v733_v56 = vsel %vm55_vm1, %v1733_v8, 0.0  ;;  %v2591_v22 = vsel %vm764_vm4, %v871_v48, %v2455_v63 }
 0x116   :  { %v992_v14 = vsel %vm55_vm1, %v984_v43, 0.0  ;;  %v1737_v9 = vpop.eup %1736  ;;  %v734_v18 = vsel %vm55_vm1, %v1735_v2, 0.0  ;;  %v989_v46 = vmul.f32 %v2550_v28, %v2105_v54  ;;  %v990_v29 = vmul.f32 %v2550_v28, %v2103_v53 }
 0x117   :  { %v857_v19 = vrot.slane %v856_v47, 2  ;;  %v993_v27 = vrot.slane %v992_v14, 4  ;;  %v1739_v55 = vpop.eup %1738  ;;  %v735_v13 = vadd.f32 %v734_v18, %v733_v56  ;;  %v999_v32 = vsel %vm55_vm1, %v985_v42, 0.0 }
 0x118   :  { %v1006_v63 = vsel %vm55_vm1, %v986_v58, 0.0  ;;  %v1741_v35 = vpop.eup %1740  ;;  %v736_v38 = vsel %vm55_vm1, %v1737_v9, 0.0  ;;  %v991_v11 = vmul.f32 %v2550_v28, %v3044_v62  ;;  %v738_v21 = vsel %vm55_vm1, %v1739_v55, 0.0 }
 0x119   :  { %v858_v57 = vadd.f32 %v857_v19, %v856_v47  ;;  %v994_v10 = vadd.f32 %v993_v27, %v992_v14  ;;  %v1743_v15 = vpop.eup %1742  ;;  %v737_v49 = vadd.f32 %v736_v38, %v735_v13  ;;  %v1000_v31 = vrot.slane %v999_v32, 4 }
 0x11a   :  { %v1007_v59 = vrot.slane %v1006_v63, 4  ;;  %v1745_v7 = vpop.eup %1744  ;;  %v740_v25 = vsel %vm55_vm1, %v1741_v35, 0.0  ;;  %v742_v36 = vsel %vm55_vm1, %v1743_v15, 0.0  ;;  %v1013_v58 = vsel %vm55_vm1, %v987_v4, 0.0 }
 0x11b   :  { %v859_v41 = vrot.slane %v858_v57, 1  ;;  %v995_v52 = vrot.slane %v994_v10, 2  ;;  %v1747_v61 = vpop.eup %1746  ;;  %v739_v43 = vadd.f32 %v738_v21, %v737_v49  ;;  %v744_v45 = vsel %vm55_vm1, %v1745_v7, 0.0 }
 0x11c   :  { %v1001_v44 = vadd.f32 %v1000_v31, %v999_v32  ;;  %v1008_v23 = vadd.f32 %v1007_v59, %v1006_v63  ;;  %v746_v17 = vsel %vm55_vm1, %v1747_v61, 0.0  ;;  %v1014_v56 = vrot.slane %v1013_v58, 4  ;;  %v1694_v31 = vld [vmem:[%s3020_s1 + $0x6] ss:$0 sm:$0xff] }
 0x11d   :  { %v860_v42 = vadd.f32 %v859_v41, %v858_v57  ;;  %v996_v48 = vadd.f32 %v995_v52, %v994_v10  ;;  %v741_v8 = vadd.f32 %v740_v25, %v739_v43  ;;  %v1020_v18 = vsel %vm55_vm1, %v988_v39, 0.0 }
 0x11e   :  { %v1002_v47 = vrot.slane %v1001_v44, 2  ;;  %v1009_v2 = vrot.slane %v1008_v23, 2  ;;  %v1027_v19 = vsel %vm55_vm1, %v989_v46, 0.0  ;;  %v1015_v32 = vadd.f32 %v1014_v56, %v1013_v58 }
 0x11f   :  { %v861_v14 = vadd.f32 %v860_v42, %v772_v34  ;;  %v997_v9 = vrot.slane %v996_v48, 1  ;;  %v743_v27 = vadd.f32 %v742_v36, %v741_v8  ;;  %v1021_v38 = vrot.slane %v1020_v18, 4 }
 0x120   :  { %v1003_v55 = vadd.f32 %v1002_v47, %v1001_v44  ;;  %v1010_v13 = vadd.f32 %v1009_v2, %v1008_v23  ;;  %v1028_v57 = vrot.slane %v1027_v19, 4  ;;  %v1016_v49 = vrot.slane %v1015_v32, 2 }
 0x121   :  { %v862_v63 = vmul.f32 %v861_v14, %v2540_v5  ;;  %v998_v35 = vadd.f32 %v997_v9, %v996_v48  ;;  %v745_v4 = vadd.f32 %v744_v45, %v743_v27  ;;  %v1022_v21 = vadd.f32 %v1021_v38, %v1020_v18 }
 0x122   :  { %v1004_v10 = vrot.slane %v1003_v55, 1  ;;  %v1011_v15 = vrot.slane %v1010_v13, 1  ;;  %v1029_v39 = vadd.f32 %v1028_v57, %v1027_v19  ;;  %v1034_v46 = vsel %vm55_vm1, %v990_v29, 0.0 }
 0x123   :  { %v2614_v34 = vadd.f32 %v862_v63, %v2506_v24  ;;  %v747_v59 = vadd.f32 %v746_v17, %v745_v4  ;;  %v1017_v36 = vadd.f32 %v1016_v49, %v1015_v32  ;;  %v1023_v41 = vrot.slane %v1022_v21, 2 }
 0x124   :  { %v1005_v7 = vadd.f32 %v1004_v10, %v1003_v55  ;;  %v1012_v25 = vadd.f32 %v1011_v15, %v1010_v13  ;;  %v1030_v52 = vrot.slane %v1029_v39, 2  ;;  %v1035_v61 = vrot.slane %v1034_v46, 4 }
 0x125   :  { %v1041_v43 = vsel %vm55_vm1, %v991_v11, 0.0  ;;  %1748 = vlog2.f32 %v747_v59  ;;  %v1018_v24 = vrot.slane %v1017_v36, 1  ;;  %v1024_v23 = vadd.f32 %v1023_v41, %v1022_v21 }
 0x126   :  { %v1042_v45 = vrot.slane %v1041_v43, 4  ;;  %v1056_v44 = vsel %vm205_vm6, %v1005_v7, %v998_v35  ;;  %v1031_v29 = vadd.f32 %v1030_v52, %v1029_v39  ;;  %v1036_v42 = vadd.f32 %v1035_v61, %v1034_v46  ;;  %v1677_v39 = vld [vmem:[%s3019_s0 + $0x30] sm:$0xff] }
 0x127   :  { %v1057_v48 = vsel %vm207_vm7, %v1012_v25, %v1056_v44  ;;  %vm1183_vm5 = vcmp.eq.s32.totalorder %v3047_v26, %v1694_v31  ;;  %v752_v17 = vsel %vm553_vm0, 1, %v3040_v33  ;;  %v1019_v58 = vadd.f32 %v1018_v24, %v1017_v36 }
 0x128   :  { %v1043_v8 = vadd.f32 %v1042_v45, %v1041_v43  ;;  %v980_v11 = vrot.slane %v2583_v12, 2  ;;  %v1025_v47 = vrot.slane %v1024_v23, 1  ;;  %v1032_v2 = vrot.slane %v1031_v29, 1 }
 0x129   :  { %v1037_v56 = vrot.slane %v1036_v42, 2  ;;  %v1058_v9 = vsel %vm209_vm8, %v1019_v58, %v1057_v48  ;;  %v2630_v18 = vsel %vm1183_vm5, 1.0, %v3048_v60  ;;  %v753_v32 = vperm.slane %v752_v17, 0 }
 0x12a   :  { %v1044_v14 = vrot.slane %v1043_v8, 2  ;;  %v1026_v19 = vadd.f32 %v1025_v47, %v1024_v23  ;;  %v1033_v27 = vadd.f32 %v1032_v2, %v1031_v29  ;;  %v1195_v63 = vmul.f32 %v2630_v18, %v2049_v3 }
 0x12b   :  { %v1038_v55 = vadd.f32 %v1037_v56, %v1036_v42  ;;  %v1749_v13 = vpop.eup %1748  ;;  %v2635_v38 = vadd.f32 %v980_v11, %v2583_v12  ;;  %v1196_v46 = vmul.f32 %v2630_v18, %v2003_v37  ;;  %v1197_v12 = vmul.f32 %v2630_v18, %v2047_v1 }
 0x12c   :  { %v1045_v30 = vadd.f32 %v1044_v14, %v1043_v8  ;;  %v749_v35 = vmul.f32 0.6931472, %v1749_v13  ;;  %v1059_v4 = vsel %vm211_vm9, %v1026_v19, %v1058_v9  ;;  %vm754_vm13 = vcmp.eq.s32.totalorder %v753_v32, 1 }
 0x12d   :  { %v1039_v57 = vrot.slane %v1038_v55, 1  ;;  %v1060_v15 = vsel %vm213_vm10, %v1033_v27, %v1059_v4  ;;  %v1203_v59 = vsel %vm55_vm1, %v1195_v63, 0.0  ;;  %v982_v25 = vrot.slane %v2635_v38, 1 }
 0x12e   :  { %v1046_v10 = vrot.slane %v1045_v30, 1  ;;  %v750_v49 = vadd.f32 %v749_v35, %v2552_v40  ;;  %v1187_v41 = vmul.f32 %v2630_v18, %v1677_v39  ;;  %v1198_v52 = vmul.f32 %v2630_v18, %v1972_v16 }
 0x12f   :  { %v1040_v21 = vadd.f32 %v1039_v57, %v1038_v55  ;;  %v1204_v61 = vrot.slane %v1203_v59, 4  ;;  %v1210_v45 = vsel %vm55_vm1, %v1196_v46, 0.0 }
 0x130   :  { %v1047_v31 = vadd.f32 %v1046_v10, %v1045_v30  ;;  %v751_v7 = vadd.f32 %v2273_v6, %v750_v49  ;;  %v1217_v6 = vsel %vm55_vm1, %v1197_v12, 0.0 }
 0x131   :  { %v1061_v40 = vsel %vm215_vm11, %v1040_v21, %v1060_v15 }
 0x132   :  { %v1062_v36 = vsel %vm217_vm12, %v1047_v31, %v1061_v40  ;;  %v2656_v43 = vsel %vm754_vm13, %v751_v7, %v2496_v50 }
 0x133   :  { %v1064_v24 = vmul.f32 %v2024_v51, %v1062_v36  ;;  %v874_v44 = vrot.slane %v2656_v43, 1  ;;  %v875_v23 = vrot.slane %v2656_v43, 2  ;;  %v876_v29 = vrot.slane %v2656_v43, 3 }
 0x134   :  { %v877_v42 = vrot.slane %v2656_v43, 4  ;;  %v878_v48 = vrot.slane %v2656_v43, 5  ;;  %v879_v17 = vrot.slane %v2656_v43, 6  ;;  %v880_v50 = vrot.slane %v2656_v43, 7 }
 0x135   :  { %v881_v51 = vperm.slane %v2656_v43, 0  ;;  %v882_v58 = vperm.slane %v874_v44, 0  ;;  %v883_v8 = vperm.slane %v875_v23, 0  ;;  %v884_v11 = vperm.slane %v876_v29, 0 }
 0x136   :  { %v885_v47 = vperm.slane %v877_v42, 0  ;;  %v886_v2 = vperm.slane %v878_v48, 0  ;;  %v887_v56 = vperm.slane %v879_v17, 0  ;;  %v888_v14 = vperm.slane %v880_v50, 0 }
 0x137   :  { %v897_v9 = vadd.f32 %v881_v51, %v2049_v3  ;;  %v898_v19 = vadd.f32 %v882_v58, %v2003_v37  ;;  %v899_v27 = vadd.f32 %v883_v8, %v2047_v1  ;;  %v900_v55 = vadd.f32 %v884_v11, %v1972_v16 }
 0x138   :  { %v901_v13 = vadd.f32 %v885_v47, %v1977_v20  ;;  %v902_v32 = vadd.f32 %v886_v2, %v2105_v54  ;;  %v903_v30 = vadd.f32 %v887_v56, %v2103_v53  ;;  %v904_v63 = vadd.f32 %v888_v14, %v3044_v62 }
 0x139   :  { %v905_v35 = vsel %vm55_vm1, %v897_v9, -inf  ;;  %v906_v57 = vsel %vm55_vm1, %v898_v19, -inf  ;;  %v907_v4 = vsel %vm55_vm1, %v899_v27, -inf  ;;  %v908_v10 = vsel %vm55_vm1, %v900_v55, -inf }
 0x13a   :  { %v909_v15 = vsel %vm55_vm1, %v901_v13, -inf  ;;  %v911_v21 = vsel %vm55_vm1, %v902_v32, -inf  ;;  %v913_v39 = vsel %vm55_vm1, %v903_v30, -inf  ;;  %v915_v46 = vsel %vm55_vm1, %v904_v63, -inf }
 0x13b   :  { %v910_v49 = vmax.f32 %v905_v35, %v909_v15  ;;  %v912_v12 = vmax.f32 %v906_v57, %v911_v21  ;;  %v914_v31 = vmax.f32 %v907_v4, %v913_v39  ;;  %v916_v7 = vmax.f32 %v908_v10, %v915_v46 }
 0x13c   :  { %v1065_v40 = vsel %vm55_vm1, %v1064_v24, 0.0  ;;  %v1205_v29 = vadd.f32 %v1204_v61, %v1203_v59  ;;  %v1211_v42 = vrot.slane %v1210_v45, 4  ;;  %v983_v48 = vadd.f32 %v982_v25, %v2635_v38 }
 0x13d   :  { %v1066_v36 = vrot.slane %v1065_v40, 4  ;;  %v917_v44 = vmax.f32 %v910_v49, %v912_v12  ;;  %v918_v23 = vmax.f32 %v914_v31, %v916_v7  ;;  %v1218_v50 = vrot.slane %v1217_v6, 4 }
 0x13e   :  { %v2690_v58 = vsel %vm55_vm1, %v1187_v41, 0.0  ;;  %v1199_v8 = vmul.f32 %v2630_v18, %v1977_v20  ;;  %v1224_v11 = vsel %vm55_vm1, %v1198_v52, 0.0  ;;  %v2697_v47 = vmul.f32 %v2630_v18, %v2105_v54 }
 0x13f   :  { %v1067_v17 = vadd.f32 %v1066_v36, %v1065_v40  ;;  %v2687_v51 = vmax.f32 %v917_v44, %v918_v23  ;;  %v1206_v59 = vrot.slane %v1205_v29, 2  ;;  %v1212_v61 = vadd.f32 %v1211_v42, %v1210_v45  ;;  %v2712_v23 = vld [vmem:[%s3021_s2 + $0x5] sm:$0x1] }
 0x140   :  { %v1219_v52 = vadd.f32 %v1218_v50, %v1217_v6  ;;  %v1225_v35 = vrot.slane %v1224_v11, 4 }
 0x141   :  { %v1068_v24 = vrot.slane %v1067_v17, 2  ;;  %v920_v38 = vsub.f32 %v897_v9, %v2687_v51  ;;  %v921_v25 = vsub.f32 %v898_v19, %v2687_v51  ;;  %v922_v2 = vsub.f32 %v899_v27, %v2687_v51 }
 0x142   :  { %v923_v41 = vsub.f32 %v900_v55, %v2687_v51  ;;  %v924_v56 = vsub.f32 %v901_v13, %v2687_v51  ;;  %v925_v14 = vsub.f32 %v902_v32, %v2687_v51  ;;  %v926_v45 = vsub.f32 %v903_v30, %v2687_v51 }
 0x143   :  { %v928_v57 = vmul.f32 1.442695, %v920_v38  ;;  %v930_v4 = vmul.f32 1.442695, %v921_v25  ;;  %v932_v10 = vmul.f32 1.442695, %v922_v2  ;;  %v1069_v15 = vadd.f32 %v1068_v24, %v1067_v17 }
 0x144   :  { %v927_v9 = vsub.f32 %v904_v63, %v2687_v51  ;;  %v934_v49 = vmul.f32 1.442695, %v923_v41  ;;  %v1189_v19 = vrot.slane %v2690_v58, 4  ;;  %v1207_v55 = vadd.f32 %v1206_v59, %v1205_v29 }
 0x145   :  { %1750 = vpow2.f32 %v928_v57  ;;  %v1070_v27 = vrot.slane %v1069_v15, 1  ;;  %v1231_v13 = vsel %vm55_vm1, %v1199_v8, 0.0  ;;  %v936_v32 = vmul.f32 1.442695, %v924_v56 }
 0x146   :  { %1752 = vpow2.f32 %v930_v4  ;;  %v1213_v6 = vrot.slane %v1212_v61, 2  ;;  %v1220_v21 = vrot.slane %v1219_v52, 2  ;;  %v938_v39 = vmul.f32 1.442695, %v925_v14 }
 0x147   :  { %1754 = vpow2.f32 %v932_v10  ;;  %v1071_v46 = vadd.f32 %v1070_v27, %v1069_v15  ;;  %v1226_v12 = vadd.f32 %v1225_v35, %v1224_v11  ;;  %v940_v30 = vmul.f32 1.442695, %v926_v45 }
 0x148   :  { %1756 = vpow2.f32 %v934_v49  ;;  %v942_v31 = vmul.f32 1.442695, %v927_v9  ;;  %v1214_v63 = vadd.f32 %v1213_v6, %v1212_v61  ;;  %v1208_v40 = vrot.slane %v1207_v55, 1 }
 0x149   :  { %v1072_v7 = vadd.f32 %v1071_v46, %v983_v48  ;;  %v1221_v36 = vadd.f32 %v1220_v21, %v1219_v52  ;;  %v1227_v44 = vrot.slane %v1226_v12, 2  ;;  %1758 = vpow2.f32 %v936_v32 }
 0x14a   :  { %v1201_v29 = vmul.f32 %v2630_v18, %v2103_v53  ;;  %v1215_v42 = vrot.slane %v1214_v63, 1  ;;  %v1232_v17 = vrot.slane %v1231_v13, 4  ;;  %1760 = vpow2.f32 %v938_v39 }
 0x14b   :  { %v1751_v50 = vpop.eup %1750  ;;  %v1073_v8 = vmul.f32 %v1072_v7, %v2712_v23  ;;  %v1202_v48 = vmul.f32 %v2630_v18, %v3044_v62  ;;  %v1228_v11 = vadd.f32 %v1227_v44, %v1226_v12  ;;  %1762 = vpow2.f32 %v940_v30 }
 0x14c   :  { %v1753_v24 = vpop.eup %1752  ;;  %v944_v59 = vsel %vm55_vm1, %v1751_v50, 0.0  ;;  %v1222_v61 = vrot.slane %v1221_v36, 1  ;;  %v1233_v38 = vadd.f32 %v1232_v17, %v1231_v13  ;;  %1764 = vpow2.f32 %v942_v31 }
 0x14d   :  { %v1755_v25 = vpop.eup %1754  ;;  %v945_v2 = vsel %vm55_vm1, %v1753_v24, 0.0  ;;  %v2722_v41 = vadd.f32 %v1073_v8, %v2614_v34  ;;  %v1209_v56 = vadd.f32 %v1208_v40, %v1207_v55  ;;  %v1216_v35 = vadd.f32 %v1215_v42, %v1214_v63 }
 0x14e   :  { %v1757_v14 = vpop.eup %1756  ;;  %v946_v52 = vadd.f32 %v945_v2, %v944_v59  ;;  %v1234_v57 = vrot.slane %v1233_v38, 2  ;;  %v1238_v4 = vsel %vm55_vm1, %v2697_v47, 0.0  ;;  %v947_v10 = vsel %vm55_vm1, %v1755_v25, 0.0  ;;  %v1695_v47 = vld [vmem:[%s3020_s1 + $0x7] ss:$0 sm:$0xff] }
 0x14f   :  { %v1229_v15 = vrot.slane %v1228_v11, 1  ;;  %v1239_v45 = vrot.slane %v1238_v4, 4  ;;  %v1245_v9 = vsel %vm55_vm1, %v1201_v29, 0.0  ;;  %v1759_v49 = vpop.eup %1758  ;;  %v1223_v13 = vadd.f32 %v1222_v61, %v1221_v36 }
 0x150   :  { %v948_v27 = vadd.f32 %v947_v10, %v946_v52  ;;  %v1235_v32 = vadd.f32 %v1234_v57, %v1233_v38  ;;  %v1246_v34 = vrot.slane %v1245_v9, 4  ;;  %v1761_v6 = vpop.eup %1760  ;;  %v949_v55 = vsel %vm55_vm1, %v1757_v14, 0.0 }
 0x151   :  { %v1240_v21 = vadd.f32 %v1239_v45, %v1238_v4  ;;  %v1252_v39 = vsel %vm55_vm1, %v1202_v48, 0.0  ;;  %v1267_v46 = vsel %vm205_vm6, %v1216_v35, %v1209_v56  ;;  %v1763_v12 = vpop.eup %1762  ;;  %v1190_v31 = vadd.f32 %v1189_v19, %v2690_v58 }
 0x152   :  { %v950_v30 = vadd.f32 %v949_v55, %v948_v27  ;;  %v1247_v63 = vadd.f32 %v1246_v34, %v1245_v9  ;;  %v1765_v7 = vpop.eup %1764  ;;  %v951_v40 = vsel %vm55_vm1, %v1759_v49, 0.0  ;;  %v1230_v36 = vadd.f32 %v1229_v15, %v1228_v11 }
 0x153   :  { %v1241_v44 = vrot.slane %v1240_v21, 2  ;;  %v1253_v29 = vrot.slane %v1252_v39, 4  ;;  %v1236_v17 = vrot.slane %v1235_v32, 1  ;;  %v1268_v8 = vsel %vm207_vm7, %v1223_v13, %v1267_v46 }
 0x154   :  { %v952_v42 = vadd.f32 %v951_v40, %v950_v30  ;;  %v1248_v50 = vrot.slane %v1247_v63, 2  ;;  %v953_v48 = vsel %vm55_vm1, %v1761_v6, 0.0  ;;  %vm1394_vm14 = vcmp.eq.s32.totalorder %v3047_v26, %v1695_v47 }
 0x155   :  { %v1242_v24 = vadd.f32 %v1241_v44, %v1240_v21  ;;  %v1254_v59 = vadd.f32 %v1253_v29, %v1252_v39  ;;  %v955_v58 = vsel %vm55_vm1, %v1763_v12, 0.0  ;;  %v1191_v19 = vrot.slane %v1190_v31, 2 }
 0x156   :  { %v954_v61 = vadd.f32 %v953_v48, %v952_v42  ;;  %v1249_v38 = vadd.f32 %v1248_v50, %v1247_v63  ;;  %v957_v11 = vsel %vm55_vm1, %v1765_v7, 0.0  ;;  %v1269_v56 = vsel %vm209_vm8, %v1230_v36, %v1268_v8 }
 0x157   :  { %v1243_v25 = vrot.slane %v1242_v24, 1  ;;  %v1255_v2 = vrot.slane %v1254_v59, 2  ;;  %v1237_v52 = vadd.f32 %v1236_v17, %v1235_v32  ;;  %v2745_v57 = vsel %vm1394_vm14, 1.0, %v3048_v60 }
 0x158   :  { %v956_v14 = vadd.f32 %v955_v58, %v954_v61  ;;  %v1250_v35 = vrot.slane %v1249_v38, 1  ;;  %v1406_v26 = vmul.f32 %v2745_v57, %v2049_v3  ;;  %v1407_v15 = vmul.f32 %v2745_v57, %v2003_v37 }
 0x159   :  { %v1244_v4 = vadd.f32 %v1243_v25, %v1242_v24  ;;  %v1256_v10 = vadd.f32 %v1255_v2, %v1254_v59  ;;  %v1270_v49 = vsel %vm211_vm9, %v1237_v52, %v1269_v56  ;;  %v1408_v27 = vmul.f32 %v2745_v57, %v2047_v1  ;;  %v2777_v2 = vld [vmem:[%s3019_s0 + $0x38] sm:$0xff] }
 0x15a   :  { %v958_v45 = vadd.f32 %v957_v11, %v956_v14  ;;  %v1251_v9 = vadd.f32 %v1250_v35, %v1249_v38  ;;  %v1409_v34 = vmul.f32 %v2745_v57, %v1972_v16  ;;  %v1410_v55 = vmul.f32 %v2745_v57, %v1977_v20 }
 0x15b   :  { %v1257_v13 = vrot.slane %v1256_v10, 1  ;;  %v1271_v32 = vsel %vm213_vm10, %v1244_v4, %v1270_v49  ;;  %v1414_v21 = vsel %vm55_vm1, %v1406_v26, 0.0  ;;  %v1421_v39 = vsel %vm55_vm1, %v1407_v15, 0.0  ;;  %v1826_v4 = vld [vmem:[%s3019_s0 + $0x20] sm:$0xff] }
 0x15c   :  { %1766 = vlog2.f32 %v958_v45  ;;  %v1272_v60 = vsel %vm215_vm11, %v1251_v9, %v1271_v32  ;;  %v1192_v46 = vadd.f32 %v1191_v19, %v1190_v31  ;;  %v1415_v47 = vrot.slane %v1414_v21, 4 }
 0x15d   :  { %v1258_v6 = vadd.f32 %v1257_v13, %v1256_v10  ;;  %v1422_v12 = vrot.slane %v1421_v39, 4  ;;  %v1428_v30 = vsel %vm55_vm1, %v1408_v27, 0.0  ;;  %v963_v63 = vsel %vm764_vm4, 1, %v3040_v33 }
 0x15e   :  { %v1429_v40 = vrot.slane %v1428_v30, 4  ;;  %v1075_v36 = vmul.f32 %v2550_v28, %v2134_v0  ;;  %v1416_v29 = vadd.f32 %v1415_v47, %v1414_v21  ;;  %v1435_v31 = vsel %vm55_vm1, %v1409_v34, 0.0 }
 0x15f   :  { %v1273_v7 = vsel %vm217_vm12, %v1258_v6, %v1272_v60  ;;  %v1423_v42 = vadd.f32 %v1422_v12, %v1421_v39  ;;  %v1442_v50 = vsel %vm55_vm1, %v1410_v55, 0.0  ;;  %v964_v48 = vperm.slane %v963_v63, 0 }
 0x160   :  { %v1275_v44 = vmul.f32 %v2550_v28, %v1273_v7  ;;  %v1430_v17 = vadd.f32 %v1429_v40, %v1428_v30  ;;  %v1193_v24 = vrot.slane %v1192_v46, 1  ;;  %v1417_v59 = vrot.slane %v1416_v29, 2 }
 0x161   :  { %v1424_v19 = vrot.slane %v1423_v42, 2  ;;  %v1436_v38 = vrot.slane %v1435_v31, 4  ;;  %v1443_v11 = vrot.slane %v1442_v50, 4  ;;  %vm965_vm15 = vcmp.eq.s32.totalorder %v964_v48, 1 }
 0x162   :  { %v1767_v8 = vpop.eup %1766  ;;  %v1276_v5 = vsel %vm55_vm1, %v1275_v44, 0.0  ;;  %v2779_v56 = vadd.f32 %v1417_v59, %v1416_v29  ;;  %v1431_v14 = vrot.slane %v1430_v17, 2  ;;  %v2782_v52 = vsel %vm55_vm1, %v1075_v36, 0.0 }
 0x163   :  { %v960_v61 = vmul.f32 0.6931472, %v1767_v8  ;;  %v1277_v58 = vrot.slane %v1276_v5, 4  ;;  %v2784_v35 = vadd.f32 %v1193_v24, %v1192_v46  ;;  %v1411_v26 = vmul.f32 %v2745_v57, %v2105_v54 }
 0x164   :  { %v1412_v15 = vmul.f32 %v2745_v57, %v2103_v53  ;;  %v1398_v45 = vmul.f32 %v2745_v57, %v2777_v2  ;;  %v1425_v9 = vadd.f32 %v1424_v19, %v1423_v42  ;;  %v1437_v49 = vadd.f32 %v1436_v38, %v1435_v31 }
 0x165   :  { %v961_v28 = vadd.f32 %v960_v61, %v2687_v51  ;;  %v1278_v25 = vadd.f32 %v1277_v58, %v1276_v5  ;;  %v1444_v27 = vadd.f32 %v1443_v11, %v1442_v50  ;;  %v1419_v60 = vrot.slane %v2779_v56, 1 }
 0x166   :  { %v2799_v34 = vadd.f32 %v1431_v14, %v1430_v17 }
 0x167   :  { %v962_v51 = vadd.f32 %v1826_v4, %v961_v28  ;;  %v1279_v10 = vrot.slane %v1278_v25, 2 }
 0x169   :  { %v2796_v13 = vsel %vm965_vm15, %v962_v51, %v2656_v43  ;;  %v1280_v32 = vadd.f32 %v1279_v10, %v1278_v25 }
 0x16a   :  { %v1085_v6 = vrot.slane %v2796_v13, 1  ;;  %v1086_v55 = vrot.slane %v2796_v13, 2  ;;  %v1087_v21 = vrot.slane %v2796_v13, 3  ;;  %v1088_v39 = vrot.slane %v2796_v13, 4 }
 0x16b   :  { %v1089_v46 = vrot.slane %v2796_v13, 5  ;;  %v1090_v47 = vrot.slane %v2796_v13, 6  ;;  %v1091_v43 = vrot.slane %v2796_v13, 7  ;;  %v1092_v12 = vperm.slane %v2796_v13, 0 }
 0x16c   :  { %v1093_v30 = vperm.slane %v1085_v6, 0  ;;  %v1094_v63 = vperm.slane %v1086_v55, 0  ;;  %v1095_v7 = vperm.slane %v1087_v21, 0  ;;  %v1096_v40 = vperm.slane %v1088_v39, 0 }
 0x16d   :  { %v1097_v36 = vperm.slane %v1089_v46, 0  ;;  %v1098_v44 = vperm.slane %v1090_v47, 0  ;;  %v1099_v29 = vperm.slane %v1091_v43, 0  ;;  %v1108_v42 = vadd.f32 %v1092_v12, %v2049_v3 }
 0x16e   :  { %v1109_v17 = vadd.f32 %v1093_v30, %v2003_v37  ;;  %v1110_v31 = vadd.f32 %v1094_v63, %v2047_v1  ;;  %v1111_v50 = vadd.f32 %v1095_v7, %v1972_v16  ;;  %v1112_v8 = vadd.f32 %v1096_v40, %v1977_v20 }
 0x16f   :  { %v2815_v48 = vadd.f32 %v1097_v36, %v2105_v54  ;;  %v2818_v24 = vadd.f32 %v1098_v44, %v2103_v53  ;;  %v2821_v5 = vadd.f32 %v1099_v29, %v3044_v62  ;;  %v1116_v59 = vsel %vm55_vm1, %v1108_v42, -inf }
 0x170   :  { %v1117_v61 = vsel %vm55_vm1, %v1109_v17, -inf  ;;  %v1118_v58 = vsel %vm55_vm1, %v1110_v31, -inf  ;;  %v1119_v19 = vsel %vm55_vm1, %v1111_v50, -inf  ;;  %v1120_v38 = vsel %vm55_vm1, %v1112_v8, -inf }
 0x171   :  { %v1121_v11 = vmax.f32 %v1116_v59, %v1120_v38  ;;  %v1122_v28 = vsel %vm55_vm1, %v2815_v48, -inf  ;;  %v1124_v25 = vsel %vm55_vm1, %v2818_v24, -inf  ;;  %v1126_v14 = vsel %vm55_vm1, %v2821_v5, -inf }
 0x172   :  { %v1123_v4 = vmax.f32 %v1117_v61, %v1122_v28  ;;  %v1125_v51 = vmax.f32 %v1118_v58, %v1124_v25  ;;  %v1127_v10 = vmax.f32 %v1119_v19, %v1126_v14  ;;  %v1281_v6 = vrot.slane %v1280_v32, 1 }
 0x173   :  { %v2836_v55 = vmul.f32 %v2630_v18, %v2134_v0  ;;  %v1426_v21 = vrot.slane %v1425_v9, 1  ;;  %v1438_v39 = vrot.slane %v1437_v49, 2  ;;  %v1445_v46 = vrot.slane %v1444_v27, 2 }
 0x174   :  { %v1077_v47 = vrot.slane %v2782_v52, 4  ;;  %v1128_v43 = vmax.f32 %v1121_v11, %v1123_v4  ;;  %v1129_v12 = vmax.f32 %v1125_v51, %v1127_v10  ;;  %v1282_v30 = vadd.f32 %v1281_v6, %v1280_v32 }
 0x175   :  { %v2840_v63 = vsel %vm55_vm1, %v1398_v45, 0.0  ;;  %v1413_v7 = vmul.f32 %v2745_v57, %v3044_v62  ;;  %v1433_v40 = vrot.slane %v2799_v34, 1  ;;  %v1449_v36 = vsel %vm55_vm1, %v1411_v26, 0.0 }
 0x176   :  { %v2846_v44 = vmax.f32 %v1128_v43, %v1129_v12  ;;  %v1283_v29 = vadd.f32 %v1282_v30, %v2784_v35  ;;  %v1420_v59 = vadd.f32 %v1419_v60, %v2779_v56  ;;  %v1456_v61 = vsel %vm55_vm1, %v1412_v15, 0.0  ;;  %v2859_v56 = vld [vmem:[%s3021_s2 + $0x6] sm:$0x1] }
 0x177   :  { %v1427_v58 = vadd.f32 %v1426_v21, %v1425_v9  ;;  %v1439_v32 = vadd.f32 %v1438_v39, %v1437_v49  ;;  %v1446_v19 = vadd.f32 %v1445_v46, %v1444_v27  ;;  %v1450_v45 = vrot.slane %v1449_v36, 4 }
 0x178   :  { %v1131_v38 = vsub.f32 %v1108_v42, %v2846_v44  ;;  %v1132_v11 = vsub.f32 %v1109_v17, %v2846_v44  ;;  %v1133_v28 = vsub.f32 %v1110_v31, %v2846_v44  ;;  %v1134_v26 = vsub.f32 %v1111_v50, %v2846_v44 }
 0x179   :  { %v1135_v25 = vsub.f32 %v1112_v8, %v2846_v44  ;;  %v1434_v35 = vadd.f32 %v1433_v40, %v2799_v34  ;;  %v1457_v15 = vrot.slane %v1456_v61, 4  ;;  %v1463_v9 = vsel %vm55_vm1, %v1413_v7, 0.0 }
 0x17a   :  { %v1139_v49 = vmul.f32 1.442695, %v1131_v38  ;;  %v1141_v27 = vmul.f32 1.442695, %v1132_v11  ;;  %v1143_v60 = vmul.f32 1.442695, %v1133_v28  ;;  %v1284_v42 = vmul.f32 %v1283_v29, %v2859_v56 }
 0x17b   :  { %v1136_v17 = vsub.f32 %v2815_v48, %v2846_v44  ;;  %v1145_v31 = vmul.f32 1.442695, %v1134_v26  ;;  %v1440_v50 = vrot.slane %v1439_v32, 1  ;;  %v1451_v8 = vadd.f32 %v1450_v45, %v1449_v36 }
 0x17c   :  { %v1137_v14 = vsub.f32 %v2818_v24, %v2846_v44  ;;  %1768 = vpow2.f32 %v1139_v49  ;;  %v1147_v4 = vmul.f32 1.442695, %v1135_v25  ;;  %v2869_v34 = vadd.f32 %v1284_v42, %v2722_v41 }
 0x17d   :  { %1770 = vpow2.f32 %v1141_v27  ;;  %v1452_v51 = vrot.slane %v1451_v8, 2  ;;  %v1458_v10 = vadd.f32 %v1457_v15, %v1456_v61  ;;  %v1464_v6 = vrot.slane %v1463_v9, 4 }
 0x17e   :  { %v1138_v21 = vsub.f32 %v2821_v5, %v2846_v44  ;;  %1772 = vpow2.f32 %v1143_v60  ;;  %v1447_v48 = vrot.slane %v1446_v19, 1  ;;  %v1478_v39 = vsel %vm205_vm6, %v1427_v58, %v1420_v59 }
 0x17f   :  { %1774 = vpow2.f32 %v1145_v31  ;;  %v1149_v46 = vmul.f32 1.442695, %v1136_v17  ;;  %v1453_v43 = vadd.f32 %v1452_v51, %v1451_v8  ;;  %v1459_v24 = vrot.slane %v1458_v10, 2 }
 0x180   :  { %v1400_v12 = vrot.slane %v2840_v63, 4  ;;  %v1441_v30 = vadd.f32 %v1440_v50, %v1439_v32  ;;  %v1465_v41 = vadd.f32 %v1464_v6, %v1463_v9  ;;  %v1479_v7 = vsel %vm207_vm7, %v1434_v35, %v1478_v39 }
 0x181   :  { %1776 = vpow2.f32 %v1147_v4  ;;  %v1151_v40 = vmul.f32 1.442695, %v1137_v14  ;;  %v1454_v36 = vrot.slane %v1453_v43, 1  ;;  %v1460_v29 = vadd.f32 %v1459_v24, %v1458_v10 }
 0x182   :  { %v1769_v61 = vpop.eup %1768  ;;  %v1153_v5 = vmul.f32 1.442695, %v1138_v21  ;;  %v1448_v45 = vadd.f32 %v1447_v48, %v1446_v19  ;;  %v1466_v38 = vrot.slane %v1465_v41, 2  ;;  %v1480_v59 = vsel %vm209_vm8, %v1441_v30, %v1479_v7 }
 0x183   :  { %v1771_v58 = vpop.eup %1770  ;;  %1778 = vpow2.f32 %v1149_v46  ;;  %v1155_v11 = vsel %vm55_vm1, %v1769_v61, 0.0  ;;  %v1455_v28 = vadd.f32 %v1454_v36, %v1453_v43  ;;  %v1461_v26 = vrot.slane %v1460_v29, 1 }
 0x184   :  { %v1773_v32 = vpop.eup %1772  ;;  %v1156_v25 = vsel %vm55_vm1, %v1771_v58, 0.0  ;;  %v1467_v35 = vadd.f32 %v1466_v38, %v1465_v41  ;;  %v1481_v15 = vsel %vm211_vm9, %v1448_v45, %v1480_v59  ;;  %v1497_v9 = vmul.f32 %v2745_v57, %v2134_v0 }
 0x185   :  { %v1775_v49 = vpop.eup %1774  ;;  %1780 = vpow2.f32 %v1151_v40  ;;  %v1157_v19 = vadd.f32 %v1156_v25, %v1155_v11  ;;  %v1462_v27 = vadd.f32 %v1461_v26, %v1460_v29  ;;  %v1482_v60 = vsel %vm213_vm10, %v1455_v28, %v1481_v15 }
 0x186   :  { %v1158_v42 = vsel %vm55_vm1, %v1773_v32, 0.0  ;;  %v1287_v17 = vsel %vm55_vm1, %v2836_v55, 0.0  ;;  %v1468_v31 = vrot.slane %v1467_v35, 1  ;;  %1782 = vpow2.f32 %v1153_v5 }
 0x187   :  { %v1777_v50 = vpop.eup %1776  ;;  %v1159_v8 = vadd.f32 %v1158_v42, %v1157_v19  ;;  %v1483_v14 = vsel %vm215_vm11, %v1462_v27, %v1482_v60  ;;  %v1160_v4 = vsel %vm55_vm1, %v1775_v49, 0.0  ;;  %v1401_v57 = vadd.f32 %v1400_v12, %v2840_v63 }
 0x188   :  { %v1469_v51 = vadd.f32 %v1468_v31, %v1467_v35  ;;  %v1078_v6 = vadd.f32 %v1077_v47, %v2782_v52  ;;  %v1288_v48 = vrot.slane %v1287_v17, 4  ;;  %v1498_v55 = vsel %vm55_vm1, %v1497_v9, 0.0 }
 0x189   :  { %v1779_v10 = vpop.eup %1778  ;;  %v1161_v21 = vadd.f32 %v1160_v4, %v1159_v8  ;;  %v1162_v39 = vsel %vm55_vm1, %v1777_v50, 0.0  ;;  %v1402_v12 = vrot.slane %v1401_v57, 2  ;;  %v1499_v41 = vrot.slane %v1498_v55, 4 }
 0x18a   :  { %v1484_v46 = vsel %vm217_vm12, %v1469_v51, %v1483_v14  ;;  %v1164_v63 = vsel %vm55_vm1, %v1779_v10, 0.0  ;;  %v1079_v40 = vrot.slane %v1078_v6, 2  ;;  %v1289_v52 = vadd.f32 %v1288_v48, %v1287_v17 }
 0x18b   :  { %v1781_v43 = vpop.eup %1780  ;;  %v1163_v24 = vadd.f32 %v1162_v39, %v1161_v21  ;;  %v1486_v30 = vmul.f32 %v2630_v18, %v1484_v46  ;;  %v1403_v38 = vadd.f32 %v1402_v12, %v1401_v57  ;;  %v1500_v58 = vadd.f32 %v1499_v41, %v1498_v55  ;;  %v1827_v21 = vld [vmem:[%s3019_s0 + $0x28] sm:$0xff] }
 0x18c   :  { %v1783_v7 = vpop.eup %1782  ;;  %v1166_v29 = vsel %vm55_vm1, %v1781_v43, 0.0  ;;  %v1080_v18 = vadd.f32 %v1079_v40, %v1078_v6  ;;  %v1290_v28 = vrot.slane %v1289_v52, 2  ;;  %vm975_vm6 = vcmp.gt.f32.partialorder %v2712_v23, 0.5  ;;  %v2908_v6 = vld [vmem:[%s3021_s2 + $0x7] sm:$0x1] }
 0x18d   :  { %v1165_v36 = vadd.f32 %v1164_v63, %v1163_v24  ;;  %v1487_v47 = vsel %vm55_vm1, %v1486_v30, 0.0  ;;  %v1168_v45 = vsel %vm55_vm1, %v1783_v7, 0.0  ;;  %v1404_v32 = vrot.slane %v1403_v38, 1 }
 0x18e   :  { %v1488_v61 = vrot.slane %v1487_v47, 4  ;;  %v1501_v35 = vrot.slane %v1500_v58, 2  ;;  %v1081_v15 = vrot.slane %v1080_v18, 1  ;;  %v1291_v9 = vadd.f32 %v1290_v28, %v1289_v52 }
 0x18f   :  { %v1167_v5 = vadd.f32 %v1166_v29, %v1165_v36  ;;  %v1174_v49 = vsel %vm975_vm6, 1, %v3040_v33  ;;  %v1405_v27 = vadd.f32 %v1404_v32, %v1403_v38  ;;  %vm1186_vm7 = vcmp.gt.f32.partialorder %v2859_v56, 0.5 }
 0x190   :  { %v1489_v59 = vadd.f32 %v1488_v61, %v1487_v47  ;;  %v1502_v42 = vadd.f32 %v1501_v35, %v1500_v58  ;;  %v1082_v31 = vadd.f32 %v1081_v15, %v1080_v18  ;;  %v1175_v50 = vperm.slane %v1174_v49, 0 }
 0x191   :  { %v1169_v11 = vadd.f32 %v1168_v45, %v1167_v5  ;;  %v1292_v8 = vrot.slane %v1291_v9, 1  ;;  %vm1397_vm9 = vcmp.gt.f32.partialorder %v2908_v6, 0.5  ;;  %vm1623_vm12 = vcmask 8192  }
 0x192   :  { %v1490_v26 = vrot.slane %v1489_v59, 2  ;;  %v1083_v4 = vsel %vm975_vm6, %v1082_v31, %v2591_v22  ;;  %v1503_v51 = vrot.slane %v1502_v42, 1  ;;  %vm1176_vm8 = vcmp.eq.s32.totalorder %v1175_v50, 1 }
 0x193   :  { %1784 = vlog2.f32 %v1169_v11  ;;  %v1293_v10 = vadd.f32 %v1292_v8, %v1291_v9 }
 0x194   :  { %v1491_v25 = vadd.f32 %v1490_v26, %v1489_v59  ;;  %v1504_v39 = vadd.f32 %v1503_v51, %v1502_v42 }
 0x195   :  { %v1294_v22 = vsel %vm1186_vm7, %v1293_v10, %v1083_v4 }
 0x196   :  { %v1492_v19 = vrot.slane %v1491_v25, 1  ;;  %v1505_v50 = vsel %vm1397_vm9, %v1504_v39, %v1294_v22 }
 0x198   :  { %v1493_v60 = vadd.f32 %v1492_v19, %v1491_v25 }
 0x199   :  { %v1785_v17 = vpop.eup %1784 }
 0x19a   :  { %v1171_v14 = vmul.f32 0.6931472, %v1785_v17  ;;  %v1494_v23 = vadd.f32 %v1493_v60, %v1405_v27 }
 0x19c   :  { %v1172_v57 = vadd.f32 %v1171_v14, %v2846_v44  ;;  %v1495_v55 = vmul.f32 %v1494_v23, %v2908_v6 }
 0x19e   :  { %v1173_v48 = vadd.f32 %v1827_v21, %v1172_v57  ;;  %v1496_v31 = vadd.f32 %v1495_v55, %v2869_v34 }
 0x1a0   :  { %v2916_v44 = vsel %vm1176_vm8, %v1173_v48, %v2796_v13  ;;  %v2947_v4 = vadd.f32 %v1505_v50, %v1496_v31  ;;  %v1828_v31 = vld [vmem:[%s3019_s0 + $0x30] sm:$0xff] }
 0x1a1   :  { %v1296_v46 = vrot.slane %v2916_v44, 1  ;;  %v1297_v43 = vrot.slane %v2916_v44, 2  ;;  %v1298_v24 = vrot.slane %v2916_v44, 3  ;;  %v1299_v30 = vrot.slane %v2916_v44, 4 }
 0x1a2   :  { %v1300_v63 = vrot.slane %v2916_v44, 5  ;;  %v1301_v12 = vrot.slane %v2916_v44, 6  ;;  %v1302_v13 = vrot.slane %v2916_v44, 7  ;;  %v1303_v41 = vperm.slane %v2916_v44, 0 }
 0x1a3   :  { %v1304_v7 = vperm.slane %v1296_v46, 0  ;;  %v1305_v40 = vperm.slane %v1297_v43, 0  ;;  %v1306_v36 = vperm.slane %v1298_v24, 0  ;;  %v1307_v52 = vperm.slane %v1299_v30, 0 }
 0x1a4   :  { %v1308_v47 = vperm.slane %v1300_v63, 0  ;;  %v1309_v29 = vperm.slane %v1301_v12, 0  ;;  %v1310_v61 = vperm.slane %v1302_v13, 0  ;;  %v1319_v5 = vadd.f32 %v1303_v41, %v2049_v3 }
 0x1a5   :  { %v1320_v45 = vadd.f32 %v1304_v7, %v2003_v37  ;;  %v1321_v38 = vadd.f32 %v1305_v40, %v2047_v1  ;;  %v1322_v59 = vadd.f32 %v1306_v36, %v1972_v16  ;;  %v1323_v58 = vadd.f32 %v1307_v52, %v1977_v20 }
 0x1a6   :  { %v1324_v18 = vadd.f32 %v1308_v47, %v2105_v54  ;;  %v1325_v11 = vadd.f32 %v1309_v29, %v2103_v53  ;;  %v1326_v28 = vadd.f32 %v1310_v61, %v3044_v62  ;;  %v1327_v26 = vsel %vm55_vm1, %v1319_v5, -inf }
 0x1a7   :  { %v1328_v32 = vsel %vm55_vm1, %v1320_v45, -inf  ;;  %v1329_v25 = vsel %vm55_vm1, %v1321_v38, -inf  ;;  %v1330_v35 = vsel %vm55_vm1, %v1322_v59, -inf  ;;  %v1331_v15 = vsel %vm55_vm1, %v1323_v58, -inf }
 0x1a8   :  { %v1332_v9 = vmax.f32 %v1327_v26, %v1331_v15  ;;  %v1333_v49 = vsel %vm55_vm1, %v1324_v18, -inf  ;;  %v1335_v19 = vsel %vm55_vm1, %v1325_v11, -inf  ;;  %v1337_v27 = vsel %vm55_vm1, %v1326_v28, -inf }
 0x1a9   :  { %v1334_v60 = vmax.f32 %v1328_v32, %v1333_v49  ;;  %v1336_v42 = vmax.f32 %v1329_v25, %v1335_v19  ;;  %v1338_v17 = vmax.f32 %v1330_v35, %v1337_v27  ;;  %v1385_v19 = vsel %vm1186_vm7, 1, %v3040_v33 }
 0x1ab   :  { %v1339_v8 = vmax.f32 %v1332_v9, %v1334_v60  ;;  %v1340_v14 = vmax.f32 %v1336_v42, %v1338_v17  ;;  %v1386_v60 = vperm.slane %v1385_v19, 0 }
 0x1ad   :  { %v1341_v57 = vmax.f32 %v1339_v8, %v1340_v14  ;;  %vm1387_vm10 = vcmp.eq.s32.totalorder %v1386_v60, 1 }
 0x1af   :  { %v1342_v23 = vsub.f32 %v1319_v5, %v1341_v57  ;;  %v1343_v51 = vsub.f32 %v1320_v45, %v1341_v57  ;;  %v1344_v10 = vsub.f32 %v1321_v38, %v1341_v57  ;;  %v1345_v21 = vsub.f32 %v1322_v59, %v1341_v57 }
 0x1b0   :  { %v1346_v48 = vsub.f32 %v1323_v58, %v1341_v57  ;;  %v1347_v30 = vsub.f32 %v1324_v18, %v1341_v57  ;;  %v1348_v34 = vsub.f32 %v1325_v11, %v1341_v57  ;;  %v1349_v22 = vsub.f32 %v1326_v28, %v1341_v57 }
 0x1b1   :  { %v1350_v46 = vmul.f32 1.442695, %v1342_v23  ;;  %v1352_v43 = vmul.f32 1.442695, %v1343_v51  ;;  %v1354_v24 = vmul.f32 1.442695, %v1344_v10 }
 0x1b2   :  { %v1356_v63 = vmul.f32 1.442695, %v1345_v21  ;;  %v1358_v55 = vmul.f32 1.442695, %v1346_v48  ;;  %v1360_v39 = vmul.f32 1.442695, %v1347_v30 }
 0x1b3   :  { %1786 = vpow2.f32 %v1350_v46  ;;  %v1362_v12 = vmul.f32 1.442695, %v1348_v34  ;;  %v1364_v7 = vmul.f32 1.442695, %v1349_v22 }
 0x1b4   :  { %1788 = vpow2.f32 %v1352_v43 }
 0x1b5   :  { %1790 = vpow2.f32 %v1354_v24 }
 0x1b6   :  { %1792 = vpow2.f32 %v1356_v63 }
 0x1b7   :  { %1794 = vpow2.f32 %v1358_v55 }
 0x1b8   :  { %1796 = vpow2.f32 %v1360_v39 }
 0x1b9   :  { %v1787_v13 = vpop.eup %1786  ;;  %1798 = vpow2.f32 %v1362_v12 }
 0x1ba   :  { %v1789_v41 = vpop.eup %1788  ;;  %v1366_v40 = vsel %vm55_vm1, %v1787_v13, 0.0  ;;  %1800 = vpow2.f32 %v1364_v7 }
 0x1bb   :  { %v1791_v36 = vpop.eup %1790  ;;  %v1367_v52 = vsel %vm55_vm1, %v1789_v41, 0.0 }
 0x1bc   :  { %v1793_v47 = vpop.eup %1792  ;;  %v1368_v29 = vadd.f32 %v1367_v52, %v1366_v40  ;;  %v1369_v61 = vsel %vm55_vm1, %v1791_v36, 0.0 }
 0x1bd   :  { %v1795_v5 = vpop.eup %1794  ;;  %v1371_v38 = vsel %vm55_vm1, %v1793_v47, 0.0 }
 0x1be   :  { %v1370_v45 = vadd.f32 %v1369_v61, %v1368_v29  ;;  %v1797_v59 = vpop.eup %1796  ;;  %v1373_v18 = vsel %vm55_vm1, %v1795_v5, 0.0 }
 0x1bf   :  { %v1799_v11 = vpop.eup %1798  ;;  %v1375_v26 = vsel %vm55_vm1, %v1797_v59, 0.0 }
 0x1c0   :  { %v1372_v58 = vadd.f32 %v1371_v38, %v1370_v45  ;;  %v1801_v32 = vpop.eup %1800  ;;  %v1377_v35 = vsel %vm55_vm1, %v1799_v11, 0.0 }
 0x1c1   :  { %v1379_v9 = vsel %vm55_vm1, %v1801_v32, 0.0 }
 0x1c2   :  { %v1374_v28 = vadd.f32 %v1373_v18, %v1372_v58 }
 0x1c4   :  { %v1376_v25 = vadd.f32 %v1375_v26, %v1374_v28 }
 0x1c6   :  { %v1378_v15 = vadd.f32 %v1377_v35, %v1376_v25 }
 0x1c8   :  { %v1380_v49 = vadd.f32 %v1379_v9, %v1378_v15 }
 0x1ca   :  { %1802 = vlog2.f32 %v1380_v49 }
 0x1d0   :  { %v1803_v27 = vpop.eup %1802 }
 0x1d1   :  { %v1382_v42 = vmul.f32 0.6931472, %v1803_v27 }
 0x1d3   :  { %v1383_v17 = vadd.f32 %v1382_v42, %v1341_v57 }
 0x1d5   :  { %v1384_v50 = vadd.f32 %v1828_v31, %v1383_v17 }
 0x1d7   :  { %v2964_v8 = vsel %vm1387_vm10, %v1384_v50, %v2916_v44 }
 0x1d8   :  { %v1507_v14 = vrot.slane %v2964_v8, 1  ;;  %v1508_v23 = vrot.slane %v2964_v8, 2  ;;  %v1509_v56 = vrot.slane %v2964_v8, 3  ;;  %v1510_v51 = vrot.slane %v2964_v8, 4 }
 0x1d9   :  { %v1511_v10 = vrot.slane %v2964_v8, 5  ;;  %v1512_v57 = vrot.slane %v2964_v8, 6  ;;  %v1513_v21 = vrot.slane %v2964_v8, 7  ;;  %v1514_v48 = vperm.slane %v2964_v8, 0 }
 0x1da   :  { %v1515_v46 = vperm.slane %v1507_v14, 0  ;;  %v1516_v43 = vperm.slane %v1508_v23, 0  ;;  %v1517_v44 = vperm.slane %v1509_v56, 0  ;;  %v1518_v24 = vperm.slane %v1510_v51, 0 }
 0x1db   :  { %v1519_v30 = vperm.slane %v1511_v10, 0  ;;  %v1520_v63 = vperm.slane %v1512_v57, 0  ;;  %v1521_v34 = vperm.slane %v1513_v21, 0  ;;  %v1530_v55 = vadd.f32 %v1514_v48, %v2049_v3 }
 0x1dc   :  { %v1531_v22 = vadd.f32 %v1515_v46, %v2003_v37  ;;  %v1532_v39 = vadd.f32 %v1516_v43, %v2047_v1  ;;  %v1533_v12 = vadd.f32 %v1517_v44, %v1972_v16  ;;  %v1534_v13 = vadd.f32 %v1518_v24, %v1977_v20 }
 0x1dd   :  { %v1535_v41 = vadd.f32 %v1519_v30, %v2105_v54  ;;  %v1536_v7 = vadd.f32 %v1520_v63, %v2103_v53  ;;  %v1537_v40 = vadd.f32 %v1521_v34, %v3044_v62  ;;  %v1538_v36 = vsel %vm55_vm1, %v1530_v55, -inf }
 0x1de   :  { %v1539_v52 = vsel %vm55_vm1, %v1531_v22, -inf  ;;  %v1540_v3 = vsel %vm55_vm1, %v1532_v39, -inf  ;;  %v1541_v37 = vsel %vm55_vm1, %v1533_v12, -inf  ;;  %v1542_v1 = vsel %vm55_vm1, %v1534_v13, -inf }
 0x1df   :  { %v1543_v47 = vmax.f32 %v1538_v36, %v1542_v1  ;;  %v1544_v16 = vsel %vm55_vm1, %v1535_v41, -inf  ;;  %v1546_v20 = vsel %vm55_vm1, %v1536_v7, -inf  ;;  %v1548_v54 = vsel %vm55_vm1, %v1537_v40, -inf }
 0x1e0   :  { %v1545_v53 = vmax.f32 %v1539_v52, %v1544_v16  ;;  %v1547_v29 = vmax.f32 %v1540_v3, %v1546_v20  ;;  %v1549_v62 = vmax.f32 %v1541_v37, %v1548_v54 }
 0x1e2   :  { %v1550_v61 = vmax.f32 %v1543_v47, %v1545_v53  ;;  %v1551_v5 = vmax.f32 %v1547_v29, %v1549_v62  ;;  %v1625_v62 = vld [vmem:[%s3021_s2] sm:$0xff]  ;;  %s1884_s2 = smov [#allocation2]  }
 0x1e3   :  { %s1639_s26 = sshll.u32 %s1884_s2, 4  ;;  %s1640_s26 = int_to_ptr.vmem [resolvable:$true] %s1639_s26 }
 0x1e4   :  { %v1552_v45 = vmax.f32 %v1550_v61, %v1551_v5 }
 0x1e6   :  { %v1553_v38 = vsub.f32 %v1530_v55, %v1552_v45  ;;  %v1554_v59 = vsub.f32 %v1531_v22, %v1552_v45  ;;  %v1555_v58 = vsub.f32 %v1532_v39, %v1552_v45  ;;  %v1556_v18 = vsub.f32 %v1533_v12, %v1552_v45 }
 0x1e7   :  { %v1557_v11 = vsub.f32 %v1534_v13, %v1552_v45  ;;  %v1558_v25 = vsub.f32 %v1535_v41, %v1552_v45  ;;  %v1559_v15 = vsub.f32 %v1536_v7, %v1552_v45  ;;  %v1560_v49 = vsub.f32 %v1537_v40, %v1552_v45 }
 0x1e8   :  { %v1561_v28 = vmul.f32 1.442695, %v1553_v38  ;;  %v1563_v26 = vmul.f32 1.442695, %v1554_v59  ;;  %v1565_v32 = vmul.f32 1.442695, %v1555_v58 }
 0x1e9   :  { %v1567_v35 = vmul.f32 1.442695, %v1556_v18  ;;  %v1569_v9 = vmul.f32 1.442695, %v1557_v11  ;;  %v1571_v19 = vmul.f32 1.442695, %v1558_v25 }
 0x1ea   :  { %1804 = vpow2.f32 %v1561_v28  ;;  %v1573_v27 = vmul.f32 1.442695, %v1559_v15  ;;  %v1575_v17 = vmul.f32 1.442695, %v1560_v49  ;;  %v1596_v13 = vsel %vm1397_vm9, 1, %v3040_v33 }
 0x1eb   :  { %1806 = vpow2.f32 %v1563_v26  ;;  %v1597_v7 = vperm.slane %v1596_v13, 0 }
 0x1ec   :  { %1808 = vpow2.f32 %v1565_v32 }
 0x1ed   :  { %1810 = vpow2.f32 %v1567_v35  ;;  %vm1598_vm11 = vcmp.eq.s32.totalorder %v1597_v7, 1 }
 0x1ee   :  { %1812 = vpow2.f32 %v1569_v9 }
 0x1ef   :  { %1814 = vpow2.f32 %v1571_v19 }
 0x1f0   :  { %v1805_v60 = vpop.eup %1804  ;;  %1816 = vpow2.f32 %v1573_v27 }
 0x1f1   :  { %v1807_v42 = vpop.eup %1806  ;;  %v1577_v31 = vsel %vm55_vm1, %v1805_v60, 0.0  ;;  %1818 = vpow2.f32 %v1575_v17 }
 0x1f2   :  { %v1809_v50 = vpop.eup %1808  ;;  %v1578_v14 = vsel %vm55_vm1, %v1807_v42, 0.0 }
 0x1f3   :  { %v1811_v23 = vpop.eup %1810  ;;  %v1579_v56 = vadd.f32 %v1578_v14, %v1577_v31  ;;  %v1580_v51 = vsel %vm55_vm1, %v1809_v50, 0.0 }
 0x1f4   :  { %v1813_v10 = vpop.eup %1812  ;;  %v1582_v21 = vsel %vm55_vm1, %v1811_v23, 0.0 }
 0x1f5   :  { %v1581_v57 = vadd.f32 %v1580_v51, %v1579_v56  ;;  %v1815_v48 = vpop.eup %1814  ;;  %v1584_v43 = vsel %vm55_vm1, %v1813_v10, 0.0 }
 0x1f6   :  { %v1817_v44 = vpop.eup %1816  ;;  %v1586_v30 = vsel %vm55_vm1, %v1815_v48, 0.0 }
 0x1f7   :  { %v1583_v46 = vadd.f32 %v1582_v21, %v1581_v57  ;;  %v1819_v63 = vpop.eup %1818  ;;  %v1588_v55 = vsel %vm55_vm1, %v1817_v44, 0.0 }
 0x1f8   :  { %v1590_v39 = vsel %vm55_vm1, %v1819_v63, 0.0 }
 0x1f9   :  { %v1585_v24 = vadd.f32 %v1584_v43, %v1583_v46 }
 0x1fb   :  { %v1587_v34 = vadd.f32 %v1586_v30, %v1585_v24 }
 0x1fd   :  { %v1589_v22 = vadd.f32 %v1588_v55, %v1587_v34 }
 0x1ff   :  { %v1591_v12 = vadd.f32 %v1590_v39, %v1589_v22 }
 0x201   :  { %1820 = vlog2.f32 %v1591_v12 }
 0x207   :  { %v1821_v41 = vpop.eup %1820 }
 0x208   :  { %v1593_v40 = vmul.f32 0.6931472, %v1821_v41 }
 0x20a   :  { %v1594_v36 = vadd.f32 %v1593_v40, %v1552_v45 }
 0x20c   :  { %v1595_v52 = vadd.f32 %v2777_v2, %v1594_v36  ;;  %v1626_v2 = vsel %vm55_vm1, %v1625_v62, 0.0 }
 0x20e   :  { %v1599_v3 = vsel %vm1598_vm11, %v1595_v52, %v2964_v8  ;;  %v1627_v8 = vrot.slane %v1626_v2, 4 }
 0x20f   :  { %v1600_v37 = vadd.f32 %v1599_v3, %v2134_v0 }
 0x210   :  { %v1628_v0 = vadd.f32 %v1627_v8, %v1626_v2 }
 0x211   :  { %v1601_v1 = vsel %vm55_vm1, %v1600_v37, -inf }
 0x212   :  { %v1602_v47 = vrot.slane %v1601_v1, 4  ;;  %v1629_v38 = vrot.slane %v1628_v0, 2 }
 0x214   :  { %v1603_v16 = vmax.f32 %v1601_v1, %v1602_v47  ;;  %v1630_v58 = vadd.f32 %v1629_v38, %v1628_v0 }
 0x216   :  { %v1604_v20 = vrot.slane %v1603_v16, 2  ;;  %v1631_v11 = vrot.slane %v1630_v58, 1 }
 0x218   :  { %v1605_v54 = vmax.f32 %v1603_v16, %v1604_v20  ;;  %v1632_v26 = vadd.f32 %v1631_v11, %v1630_v58 }
 0x21a   :  { %v1606_v53 = vrot.slane %v1605_v54, 1  ;;  %1633 = vst.msk [vmem:[#allocation4] sm:$0x1] %vm1623_vm12, %v1632_v26 }
 0x21b   :  { %1655 = dma.vmem_to_hbm [thread:$0]  %s1651_s24, 16, %s1653_s25, [#allocation5]  }
 0x21c   :  { %v1607_v6 = vmax.f32 %v1605_v54, %v1606_v53 }
 0x21e   :  { %v1608_v33 = vsub.f32 %v1600_v37, %v1607_v6 }
 0x220   :  { %v1609_v29 = vmul.f32 1.442695, %v1608_v33 }
 0x222   :  { %1822 = vpow2.f32 %v1609_v29 }
 0x228   :  { %v1823_v61 = vpop.eup %1822 }
 0x229   :  { %v1611_v5 = vsel %vm55_vm1, %v1823_v61, 0.0 }
 0x22a   :  { %v1612_v45 = vrot.slane %v1611_v5, 4 }
 0x22c   :  { %v1613_v59 = vadd.f32 %v1612_v45, %v1611_v5 }
 0x22e   :  { %v1614_v18 = vrot.slane %v1613_v59, 2 }
 0x230   :  { %v1615_v28 = vadd.f32 %v1614_v18, %v1613_v59 }
 0x232   :  { %v1616_v32 = vrot.slane %v1615_v28, 1 }
 0x234   :  { %v1617_v25 = vadd.f32 %v1616_v32, %v1615_v28 }
 0x236   :  { %1824 = vlog2.f32 %v1617_v25 }
 0x23c   :  { %v1825_v35 = vpop.eup %1824 }
 0x23d   :  { %v1619_v15 = vmul.f32 0.6931472, %v1825_v35 }
 0x23f   :  { %v1620_v9 = vadd.f32 %v1619_v15, %v1607_v6 }
 0x241   :  { %v1622_v49 = vsub.f32 %v2947_v4, %v1620_v9 }
 0x243   :  { %1624 = vst.msk [vmem:[#allocation2] sm:$0x1] %vm1623_vm12, %v1622_v49 }
 0x244   :  { %1644 = dma.vmem_to_hbm [thread:$0]  %s1640_s26, 16, %s1642_s8, [#allocation3]  }
 0x245   :  { %1877 = dma.done.wait [#allocation3], 16  }
 0x246   :  { %1878 = vsyncadd [#allocation3], 4294967280 }
 0x247   :  { %1879 = dma.done.wait [#allocation5], 16  }
 0x248   :  { %1880 = vsyncadd [#allocation5], 4294967280 }
 0x249   :  { %1664 = vsyncpa [#allocation3], 1 }
 0x24a   :  { %1665 = vsyncpa [#allocation5], 1 }

</bundles_post_ra>
